<compile_context>
chip_gen: v7x
topology: tpu7x:2x2x1
jax: 0.10.0
libtpu: 0.0.40
codegen_flags: <defaults>
</compile_context>

<pallas_src>
import math
import jax
import jax.numpy as jnp
from jax import lax
from jax.experimental import pallas as pl
from jax.experimental.pallas import tpu as pltpu

RESIDUAL_SCALER = math.sqrt(0.5)
LN_EPS = 1e-5
VMEM_LIMIT = 32 * 1024 * 1024  # re-derive per chip; keeps v7x (64 MiB) safe


def _round_up(x, m):
    return ((x + m - 1) // m) * m


def _full_spec(shape):
    # One whole-array block; index_map returns all-zero block index.
    return pl.BlockSpec(shape, lambda i, _nd=len(shape): (0,) * _nd)


# --------------------------------------------------------------------------
# Hoisted input-side gates matmul:  gx = x @ [w_ih_f | w_ih_b] + [b_f | b_b]
# Tiled over rows (and output columns when 8H is large) -> MXU-efficient.
# --------------------------------------------------------------------------
def _gates_kernel(x_ref, w_ref, b_ref, o_ref):
    o_ref[...] = (jnp.dot(x_ref[...], w_ref[...],
                          preferred_element_type=jnp.float32)
                  + b_ref[...]).astype(o_ref.dtype)


def input_gates_matmul(x2d, w_x, b_x, row_tile=256, col_tile=512):
    # x2d: (N, Din), w_x: (Din, G), b_x: (1, G) -> (N, G) float32
    N, Din = x2d.shape
    G = w_x.shape[1]
    tm = min(row_tile, _round_up(N, 8))
    Np = _round_up(N, tm)
    if Np != N:
        x2d = jnp.pad(x2d, ((0, Np - N), (0, 0)))
    tn = col_tile if (G > col_tile and G % col_tile == 0) else G
    out = pl.pallas_call(
        _gates_kernel,
        grid=(Np // tm, G // tn),
        in_specs=[pl.BlockSpec((tm, Din), lambda i, j: (i, 0)),
                  pl.BlockSpec((Din, tn), lambda i, j: (0, j)),
                  pl.BlockSpec((1, tn), lambda i, j: (0, j))],
        out_specs=pl.BlockSpec((tm, tn), lambda i, j: (i, j)),
        out_shape=jax.ShapeDtypeStruct((Np, G), jnp.float32),
        compiler_params=pltpu.CompilerParams(
            dimension_semantics=("parallel", "parallel"),
            vmem_limit_bytes=VMEM_LIMIT),
    )(x2d, w_x, b_x)
    return out[:N]


# --------------------------------------------------------------------------
# Fused BiLSTM layer kernel:
#   * interleaved fwd/bwd recurrence (one step of each per iteration),
#     per-step work is only h @ w_hh (input gates are precomputed),
#   * epilogue fuses concat(fwd, bwd) + mask + residual (l>=2) + LayerNorm
#     while everything is still VMEM-resident.
# --------------------------------------------------------------------------
def _make_bilstm_fused_kernel(T, B, H, has_residual):
    G4 = 4 * H

    def kernel(*refs):
        if has_residual:
            (gx_ref, m_ref, whf_ref, whb_ref, prev_ref,
             out_ref, accf_ref, accb_ref) = refs
        else:
            (gx_ref, m_ref, whf_ref, whb_ref,
             out_ref, accf_ref, accb_ref) = refs

        w_hf = whf_ref[...]            # (H, 4H)
        w_hb = whb_ref[...]            # (H, 4H)

        def gate_split(pre):
            i_g = jax.nn.sigmoid(pre[:, 0 * H:1 * H])
            f_g = jax.nn.sigmoid(pre[:, 1 * H:2 * H])
            g_g = jnp.tanh(pre[:, 2 * H:3 * H])
            o_g = jax.nn.sigmoid(pre[:, 3 * H:4 * H])
            return i_g, f_g, g_g, o_g

        def body(s, carry):
            hf, cf, hb, cb = carry
            tf = s
            tb = T - 1 - s

            gx_f = gx_ref[tf][:, 0:G4]           # (B, 4H) forward gates(x)+b
            gx_b = gx_ref[tb][:, G4:2 * G4]      # (B, 4H) backward gates(x)+b
            m_f = m_ref[tf]                      # (B, 1)
            m_b = m_ref[tb]                      # (B, 1)

            pre_f = gx_f + jnp.dot(hf, w_hf, preferred_element_type=jnp.float32)
            pre_b = gx_b + jnp.dot(hb, w_hb, preferred_element_type=jnp.float32)

            i_f, f_f, g_f, o_f = gate_split(pre_f)
            i_b, f_b, g_b, o_b = gate_split(pre_b)

            cf_new = f_f * cf + i_f * g_f
            hf_new = o_f * jnp.tanh(cf_new)
            cb_new = f_b * cb + i_b * g_b
            hb_new = o_b * jnp.tanh(cb_new)

            # packed-sequence semantics: padded steps output zero
            accf_ref[tf] = m_f * hf_new
            accb_ref[tb] = m_b * hb_new

            # padded steps do not advance the state
            hf = m_f * hf_new + (1.0 - m_f) * hf
            cf = m_f * cf_new + (1.0 - m_f) * cf
            hb = m_b * hb_new + (1.0 - m_b) * hb
            cb = m_b * cb_new + (1.0 - m_b) * cb
            return hf, cf, hb, cb

        z = jnp.zeros((B, H), jnp.float32)
        lax.fori_loop(0, T, body, (z, z, z, z))

        # ---- fused epilogue: concat + residual(masked prev) + LayerNorm ----
        y = jnp.concatenate([accf_ref[...], accb_ref[...]], axis=-1)  # (T,B,2H)
        if has_residual:
            y = RESIDUAL_SCALER * (y + m_ref[...] * prev_ref[...])
        mu = jnp.mean(y, axis=-1, keepdims=True)
        yc = y - mu
        var = jnp.mean(yc * yc, axis=-1, keepdims=True)
        out_ref[...] = (yc * lax.rsqrt(var + LN_EPS)).astype(out_ref.dtype)

    return kernel


def bilstm_layer_fused(x_tbd, mask_tb1, p, with_residual):
    # x_tbd: (T, B, Din) layer input; returns LN([h_f|h_b] (+ scaled residual))
    # of shape (T, B, 2H).  The layer input doubles as the residual `prev`.
    T, B, Din = x_tbd.shape
    H = p["w_hh_f"].shape[0]

    # hoisted input-side matmul (both directions, bias folded) -> (T*B, 8H)
    gx = input_gates_matmul(x_tbd.reshape(T * B, Din), p["w_x"], p["b_x"])
    gx = gx.reshape(T, B, 8 * H)

    kernel = _make_bilstm_fused_kernel(T, B, H, with_residual)
    args = [gx, mask_tb1, p["w_hh_f"], p["w_hh_b"]]
    if with_residual:
        args.append(x_tbd)

    # TODO(synk): for very large T*B*H this kernel should be time-chunked
    # (h/c carried in VMEM scratch across grid steps, reversed index_map for
    # the backward sweep) instead of whole-layer VMEM residency.
    return pl.pallas_call(
        kernel,
        grid=(1,),
        in_specs=[_full_spec(a.shape) for a in args],
        out_specs=_full_spec((T, B, 2 * H)),
        out_shape=jax.ShapeDtypeStruct((T, B, 2 * H), jnp.float32),
        scratch_shapes=[pltpu.VMEM((T, B, H), jnp.float32),
                        pltpu.VMEM((T, B, H), jnp.float32)],
        compiler_params=pltpu.CompilerParams(
            dimension_semantics=("arbitrary",),
            vmem_limit_bytes=VMEM_LIMIT),
    )(*args)


# --------------------------------------------------------------------------
# Final projection (Linear 2H -> H) fused with LayerNorm(H), row-tiled.
# --------------------------------------------------------------------------
def _proj_ln_kernel(x_ref, w_ref, b_ref, o_ref):
    y = (jnp.dot(x_ref[...], w_ref[...], preferred_element_type=jnp.float32)
         + b_ref[...])
    mu = jnp.mean(y, axis=-1, keepdims=True)
    yc = y - mu
    var = jnp.mean(yc * yc, axis=-1, keepdims=True)
    o_ref[...] = (yc * lax.rsqrt(var + LN_EPS)).astype(o_ref.dtype)


def project_and_norm(x2d, w, b, row_tile=256):
    N, K = x2d.shape
    H = w.shape[1]
    tm = min(row_tile, _round_up(N, 8))
    Np = _round_up(N, tm)
    if Np != N:
        x2d = jnp.pad(x2d, ((0, Np - N), (0, 0)))
    out = pl.pallas_call(
        _proj_ln_kernel,
        grid=(Np // tm,),
        in_specs=[pl.BlockSpec((tm, K), lambda i: (i, 0)),
                  pl.BlockSpec((K, H), lambda i: (0, 0)),
                  pl.BlockSpec((1, H), lambda i: (0, 0))],
        out_specs=pl.BlockSpec((tm, H), lambda i: (i, 0)),
        out_shape=jax.ShapeDtypeStruct((Np, H), jnp.float32),
        compiler_params=pltpu.CompilerParams(
            dimension_semantics=("parallel",),
            vmem_limit_bytes=VMEM_LIMIT),
    )(x2d, w, b)
    return out[:N]


# --------------------------------------------------------------------------
# Parameter init + full TextEncoder forward.
# --------------------------------------------------------------------------
def init_params(key, n_src_vocab, n_layers, d_model):
    params = {}
    key, k_embed = jax.random.split(key)
    embed = jax.random.normal(k_embed, (n_src_vocab, d_model), jnp.float32) * 0.02
    embed = embed.at[0].set(0.0)  # padding_idx = 0 (Constants.PAD)
    params["embed"] = embed

    H = d_model
    bound = 1.0 / math.sqrt(H)

    def u(k, shp):
        return jax.random.uniform(k, shp, jnp.float32, -bound, bound)

    layers = []
    for l in range(n_layers):
        Din = d_model if l == 0 else 2 * d_model
        key, k0, k1, k2, k3, k4, k5 = jax.random.split(key, 7)
        # NOTE: PyTorch nn.LSTM has separate b_ih/b_hh biases; when loading
        # real weights, sum them into this single bias.
        w_ih_f, w_ih_b = u(k0, (Din, 4 * H)), u(k3, (Din, 4 * H))
        b_f, b_b = u(k2, (1, 4 * H)), u(k5, (1, 4 * H))
        layers.append({
            # input-side weights pre-concatenated (fwd | bwd) once at init so
            # the hoisted gates matmul is a single (Din, 8H) MXU pass.
            "w_x": jnp.concatenate([w_ih_f, w_ih_b], axis=1),   # (Din, 8H)
            "b_x": jnp.concatenate([b_f, b_b], axis=1),         # (1, 8H)
            "w_hh_f": u(k1, (H, 4 * H)),
            "w_hh_b": u(k4, (H, 4 * H)),
        })
    params["layers"] = layers

    key, k_w, k_b = jax.random.split(key, 3)
    params["proj_w"] = u(k_w, (2 * d_model, d_model))
    params["proj_b"] = u(k_b, (1, d_model))
    # TODO(synk): project_init is defined in the module but unused in forward
    # (dec_init_state is returned as None), so it is not materialized here.
    return params


def text_encoder_forward(params, src_seq):
    # src_seq: (B, T) int32 token ids (batch-first, right-padded with 0)
    B, T = src_seq.shape
    d_model = params["embed"].shape[1]

    src_mask = (src_seq != 0).astype(jnp.int32)              # (B, T)
    mask_f = src_mask.astype(jnp.float32)

    # embedding gather (glue, not a hot kernel); dropout = identity (eval mode)
    src_embed = jnp.take(params["embed"], src_seq, axis=0)   # (B, T, D)

    # time-major for the recurrent kernels
    enc = jnp.transpose(src_embed, (1, 0, 2))                # (T, B, D)
    mask_tb1 = jnp.transpose(mask_f, (1, 0))[:, :, None]     # (T, B, 1)

    for l, lp in enumerate(params["layers"]):
        # concat/mask/residual/LayerNorm are fused into the BiLSTM kernel
        enc = bilstm_layer_fused(enc, mask_tb1, lp, with_residual=(l >= 2))

    out2d = project_and_norm(enc.reshape(T * B, 2 * d_model),
                             params["proj_w"], params["proj_b"])
    enc_states = jnp.transpose(out2d.reshape(T, B, d_model), (1, 0, 2))  # (B,T,D)

    return {"encoder_states": enc_states,
            "keys": enc_states,
            "src_mask": src_mask,
            "dec_init_state": None}


if __name__ == "__main__":
    key = jax.random.PRNGKey(0)
    key_params, key_tok = jax.random.split(key)

    n_src_vocab, n_layers, d_model = 50, 3, 32
    B, T = 2, 8

    params = init_params(key_params, n_src_vocab, n_layers, d_model)

    # right-padded token ids (one full-length sequence so padded length == T)
    tok = jax.random.randint(key_tok, (B, T), 1, n_src_vocab, dtype=jnp.int32)
    lengths = jnp.array([T, 5], dtype=jnp.int32)
    pos = jnp.arange(T)[None, :]
    src_seq = jnp.where(pos < lengths[:, None], tok, 0)

    fwd = jax.jit(text_encoder_forward)
    out = fwd(params, src_seq)
    jax.block_until_ready(out["encoder_states"])

    assert out["encoder_states"].shape == (B, T, d_model)
    assert out["keys"].shape == (B, T, d_model)
    assert out["src_mask"].shape == (B, T)
    assert bool(jnp.all(jnp.isfinite(out["encoder_states"])))
    print("KERNEL_OK")
</pallas_src>

<mosaic_0001>
module attributes {stable_mosaic.version = 11 : i64} {
  func.func @_gates_kernel(%arg0: i32, %arg1: i32, %arg2: memref<16x32xf32, #tpu.memory_space<vmem>>, %arg3: memref<32x256xf32, #tpu.memory_space<vmem>>, %arg4: memref<1x256xf32, #tpu.memory_space<vmem>>, %arg5: memref<16x256xf32, #tpu.memory_space<vmem>>) attributes {dimension_semantics = [#tpu.dimension_semantics<parallel>, #tpu.dimension_semantics<parallel>], iteration_bounds = array<i64: 1, 1>, scalar_prefetch = 0 : i64, scratch_operands = 0 : i64, tpu.core_type = #tpu.core_type<tc>, window_params = [{transform_indices = @transform_0, window_bounds = array<i64: 16, 32>}, {transform_indices = @transform_1, window_bounds = array<i64: 32, 256>}, {transform_indices = @transform_2, window_bounds = array<i64: 1, 256>}, {transform_indices = @transform_3, window_bounds = array<i64: 16, 256>}]} {
    %c0 = arith.constant 0 : index
    %c0_0 = arith.constant 0 : index
    %0 = vector.load %arg2[%c0, %c0_0] : memref<16x32xf32, #tpu.memory_space<vmem>>, vector<16x32xf32>
    %c0_1 = arith.constant 0 : index
    %c0_2 = arith.constant 0 : index
    %1 = vector.load %arg3[%c0_1, %c0_2] : memref<32x256xf32, #tpu.memory_space<vmem>>, vector<32x256xf32>
    %cst = arith.constant dense<0.000000e+00> : vector<16x256xf32>
    %2 = tpu.matmul %0, %1, %cst {dimension_numbers = #tpu.dot_dimension_numbers<[1], [0], [0], [1], [0, 0, 1, 1], [], []>} : vector<16x32xf32>, vector<32x256xf32>, vector<16x256xf32> -> vector<16x256xf32>
    %c0_3 = arith.constant 0 : index
    %c0_4 = arith.constant 0 : index
    %3 = vector.load %arg4[%c0_3, %c0_4] : memref<1x256xf32, #tpu.memory_space<vmem>>, vector<1x256xf32>
    %4 = vector.broadcast %3 : vector<1x256xf32> to vector<16x256xf32>
    %5 = arith.addf %2, %4 : vector<16x256xf32>
    %c0_5 = arith.constant 0 : index
    %c0_6 = arith.constant 0 : index
    %6 = vector.load %arg5[%c0_5, %c0_6] : memref<16x256xf32, #tpu.memory_space<vmem>>, vector<16x256xf32>
    tpu.vector_store %arg5[%c0_5, %c0_6], %5 {strides = array<i32>} : memref<16x256xf32, #tpu.memory_space<vmem>>, vector<16x256xf32>,
    return
  }
  func.func @transform_0(%arg0: i32, %arg1: i32) -> (i32, i32) {
    %c0_i32 = arith.constant 0 : i32
    %c0_i32_0 = arith.constant 0 : i32
    return %arg0, %c0_i32 : i32, i32
  }
  func.func @transform_1(%arg0: i32, %arg1: i32) -> (i32, i32) {
    %c0_i32 = arith.constant 0 : i32
    %c0_i32_0 = arith.constant 0 : i32
    return %c0_i32, %arg1 : i32, i32
  }
  func.func @transform_2(%arg0: i32, %arg1: i32) -> (i32, i32) {
    %c0_i32 = arith.constant 0 : i32
    %c0_i32_0 = arith.constant 0 : i32
    return %c0_i32, %arg1 : i32, i32
  }
  func.func @transform_3(%arg0: i32, %arg1: i32) -> (i32, i32) {
    %c0_i32 = arith.constant 0 : i32
    return %arg0, %arg1 : i32, i32
  }
}

module attributes {stable_mosaic.version = 11 : i64} {
  func.func @_gates_kernel(%arg0: i32, %arg1: i32, %arg2: memref<16x64xf32, #tpu.memory_space<vmem>>, %arg3: memref<64x256xf32, #tpu.memory_space<vmem>>, %arg4: memref<1x256xf32, #tpu.memory_space<vmem>>, %arg5: memref<16x256xf32, #tpu.memory_space<vmem>>) attributes {dimension_semantics = [#tpu.dimension_semantics<parallel>, #tpu.dimension_semantics<parallel>], iteration_bounds = array<i64: 1, 1>, scalar_prefetch = 0 : i64, scratch_operands = 0 : i64, tpu.core_type = #tpu.core_type<tc>, window_params = [{transform_indices = @transform_0, window_bounds = array<i64: 16, 64>}, {transform_indices = @transform_1, window_bounds = array<i64: 64, 256>}, {transform_indices = @transform_2, window_bounds = array<i64: 1, 256>}, {transform_indices = @transform_3, window_bounds = array<i64: 16, 256>}]} {
    %c0 = arith.constant 0 : index
    %c0_0 = arith.constant 0 : index
    %0 = vector.load %arg2[%c0, %c0_0] : memref<16x64xf32, #tpu.memory_space<vmem>>, vector<16x64xf32>
    %c0_1 = arith.constant 0 : index
    %c0_2 = arith.constant 0 : index
    %1 = vector.load %arg3[%c0_1, %c0_2] : memref<64x256xf32, #tpu.memory_space<vmem>>, vector<64x256xf32>
    %cst = arith.constant dense<0.000000e+00> : vector<16x256xf32>
    %2 = tpu.matmul %0, %1, %cst {dimension_numbers = #tpu.dot_dimension_numbers<[1], [0], [0], [1], [0, 0, 1, 1], [], []>} : vector<16x64xf32>, vector<64x256xf32>, vector<16x256xf32> -> vector<16x256xf32>
    %c0_3 = arith.constant 0 : index
    %c0_4 = arith.constant 0 : index
    %3 = vector.load %arg4[%c0_3, %c0_4] : memref<1x256xf32, #tpu.memory_space<vmem>>, vector<1x256xf32>
    %4 = vector.broadcast %3 : vector<1x256xf32> to vector<16x256xf32>
    %5 = arith.addf %2, %4 : vector<16x256xf32>
    %c0_5 = arith.constant 0 : index
    %c0_6 = arith.constant 0 : index
    %6 = vector.load %arg5[%c0_5, %c0_6] : memref<16x256xf32, #tpu.memory_space<vmem>>, vector<16x256xf32>
    tpu.vector_store %arg5[%c0_5, %c0_6], %5 {strides = array<i32>} : memref<16x256xf32, #tpu.memory_space<vmem>>, vector<16x256xf32>,
    return
  }
  func.func @transform_0(%arg0: i32, %arg1: i32) -> (i32, i32) {
    %c0_i32 = arith.constant 0 : i32
    %c0_i32_0 = arith.constant 0 : i32
    return %arg0, %c0_i32 : i32, i32
  }
  func.func @transform_1(%arg0: i32, %arg1: i32) -> (i32, i32) {
    %c0_i32 = arith.constant 0 : i32
    %c0_i32_0 = arith.constant 0 : i32
    return %c0_i32, %arg1 : i32, i32
  }
  func.func @transform_2(%arg0: i32, %arg1: i32) -> (i32, i32) {
    %c0_i32 = arith.constant 0 : i32
    %c0_i32_0 = arith.constant 0 : i32
    return %c0_i32, %arg1 : i32, i32
  }
  func.func @transform_3(%arg0: i32, %arg1: i32) -> (i32, i32) {
    %c0_i32 = arith.constant 0 : i32
    return %arg0, %arg1 : i32, i32
  }
}

module attributes {stable_mosaic.version = 11 : i64} {
  func.func @kernel(%arg0: i32, %arg1: memref<8x2x256xf32, #tpu.memory_space<vmem>>, %arg2: memref<8x2x1xf32, #tpu.memory_space<vmem>>, %arg3: memref<32x128xf32, #tpu.memory_space<vmem>>, %arg4: memref<32x128xf32, #tpu.memory_space<vmem>>, %arg5: memref<8x2x64xf32, #tpu.memory_space<vmem>>, %arg6: memref<8x2x32xf32, #tpu.memory_space<vmem>>, %arg7: memref<8x2x32xf32, #tpu.memory_space<vmem>>) attributes {dimension_semantics = [#tpu.dimension_semantics<arbitrary>], iteration_bounds = array<i64: 1>, scalar_prefetch = 0 : i64, scratch_operands = 2 : i64, tpu.core_type = #tpu.core_type<tc>, window_params = [{pipeline_mode = #tpu.pipeline_mode<synchronous>, transform_indices = @transform_0, window_bounds = array<i64: 8, 2, 256>}, {pipeline_mode = #tpu.pipeline_mode<synchronous>, transform_indices = @transform_1, window_bounds = array<i64: 8, 2, 1>}, {pipeline_mode = #tpu.pipeline_mode<synchronous>, transform_indices = @transform_2, window_bounds = array<i64: 32, 128>}, {pipeline_mode = #tpu.pipeline_mode<synchronous>, transform_indices = @transform_3, window_bounds = array<i64: 32, 128>}, {pipeline_mode = #tpu.pipeline_mode<synchronous>, transform_indices = @transform_4, window_bounds = array<i64: 8, 2, 64>}]} {
    %c0 = arith.constant 0 : index
    %c0_0 = arith.constant 0 : index
    %0 = vector.load %arg3[%c0, %c0_0] : memref<32x128xf32, #tpu.memory_space<vmem>>, vector<32x128xf32>
    %c0_1 = arith.constant 0 : index
    %c0_2 = arith.constant 0 : index
    %1 = vector.load %arg4[%c0_1, %c0_2] : memref<32x128xf32, #tpu.memory_space<vmem>>, vector<32x128xf32>
    %cst = arith.constant 0.000000e+00 : f32
    %2 = vector.broadcast %cst : f32 to vector<2x32xf32>
    %c0_i32 = arith.constant 0 : i32
    %c8_i32 = arith.constant 8 : i32
    %3 = arith.addi %c0_i32, %c8_i32 : i32
    %c1_i32 = arith.constant 1 : i32
    %4:4 = scf.for %arg8 = %c0_i32 to %3 step %c1_i32 iter_args(%arg9 = %2, %arg10 = %2, %arg11 = %2, %arg12 = %2) -> (vector<2x32xf32>, vector<2x32xf32>, vector<2x32xf32>, vector<2x32xf32>)  : i32 {
      %c7_i32 = arith.constant 7 : i32
      %25 = arith.subi %c7_i32, %arg8 : i32
      %26 = arith.index_cast %arg8 : i32 to index
      %c0_18 = arith.constant 0 : index
      %c0_19 = arith.constant 0 : index
      %27 = vector.load %arg1[%26, %c0_18, %c0_19] : memref<8x2x256xf32, #tpu.memory_space<vmem>>, vector<1x2x256xf32>
      %28 = vector.shape_cast %27 : vector<1x2x256xf32> to vector<2x256xf32>
      %29 = vector.extract_strided_slice %28 {offsets = [0, 0], sizes = [2, 128], strides = [1, 1]} : vector<2x256xf32> to vector<2x128xf32>
      %30 = arith.index_cast %25 : i32 to index
      %c0_20 = arith.constant 0 : index
      %c0_21 = arith.constant 0 : index
      %31 = vector.load %arg1[%30, %c0_20, %c0_21] : memref<8x2x256xf32, #tpu.memory_space<vmem>>, vector<1x2x256xf32>
      %32 = vector.shape_cast %31 : vector<1x2x256xf32> to vector<2x256xf32>
      %33 = vector.extract_strided_slice %32 {offsets = [0, 128], sizes = [2, 128], strides = [1, 1]} : vector<2x256xf32> to vector<2x128xf32>
      %34 = arith.index_cast %arg8 : i32 to index
      %c0_22 = arith.constant 0 : index
      %c0_23 = arith.constant 0 : index
      %35 = vector.load %arg2[%34, %c0_22, %c0_23] : memref<8x2x1xf32, #tpu.memory_space<vmem>>, vector<1x2x1xf32>
      %36 = vector.shape_cast %35 : vector<1x2x1xf32> to vector<2x1xf32>
      %37 = arith.index_cast %25 : i32 to index
      %c0_24 = arith.constant 0 : index
      %c0_25 = arith.constant 0 : index
      %38 = vector.load %arg2[%37, %c0_24, %c0_25] : memref<8x2x1xf32, #tpu.memory_space<vmem>>, vector<1x2x1xf32>
      %39 = vector.shape_cast %38 : vector<1x2x1xf32> to vector<2x1xf32>
      %cst_26 = arith.constant dense<0.000000e+00> : vector<2x128xf32>
      %40 = tpu.matmul %arg9, %0, %cst_26 {dimension_numbers = #tpu.dot_dimension_numbers<[1], [0], [0], [1], [0, 0, 1, 1], [], []>} : vector<2x32xf32>, vector<32x128xf32>, vector<2x128xf32> -> vector<2x128xf32>
      %41 = arith.addf %29, %40 : vector<2x128xf32>
      %cst_27 = arith.constant dense<0.000000e+00> : vector<2x128xf32>
      %42 = tpu.matmul %arg11, %1, %cst_27 {dimension_numbers = #tpu.dot_dimension_numbers<[1], [0], [0], [1], [0, 0, 1, 1], [], []>} : vector<2x32xf32>, vector<32x128xf32>, vector<2x128xf32> -> vector<2x128xf32>
      %43 = arith.addf %33, %42 : vector<2x128xf32>
      %44 = vector.extract_strided_slice %41 {offsets = [0, 0], sizes = [2, 32], strides = [1, 1]} : vector<2x128xf32> to vector<2x32xf32>
      %45 = arith.negf %44 : vector<2x32xf32>
      %46 = math.exp %45 : vector<2x32xf32>
      %cst_28 = arith.constant 1.000000e+00 : f32
      %47 = vector.broadcast %cst_28 : f32 to vector<2x32xf32>
      %48 = arith.addf %47, %46 : vector<2x32xf32>
      %49 = arith.divf %47, %48 : vector<2x32xf32>
      %50 = vector.extract_strided_slice %41 {offsets = [0, 32], sizes = [2, 32], strides = [1, 1]} : vector<2x128xf32> to vector<2x32xf32>
      %51 = arith.negf %50 : vector<2x32xf32>
      %52 = math.exp %51 : vector<2x32xf32>
      %cst_29 = arith.constant 1.000000e+00 : f32
      %53 = vector.broadcast %cst_29 : f32 to vector<2x32xf32>
      %54 = arith.addf %53, %52 : vector<2x32xf32>
      %55 = arith.divf %53, %54 : vector<2x32xf32>
      %56 = vector.extract_strided_slice %41 {offsets = [0, 64], sizes = [2, 32], strides = [1, 1]} : vector<2x128xf32> to vector<2x32xf32>
      %57 = math.tanh %56 : vector<2x32xf32>
      %58 = vector.extract_strided_slice %41 {offsets = [0, 96], sizes = [2, 32], strides = [1, 1]} : vector<2x128xf32> to vector<2x32xf32>
      %59 = arith.negf %58 : vector<2x32xf32>
      %60 = math.exp %59 : vector<2x32xf32>
      %cst_30 = arith.constant 1.000000e+00 : f32
      %61 = vector.broadcast %cst_30 : f32 to vector<2x32xf32>
      %62 = arith.addf %61, %60 : vector<2x32xf32>
      %63 = arith.divf %61, %62 : vector<2x32xf32>
      %64 = vector.extract_strided_slice %43 {offsets = [0, 0], sizes = [2, 32], strides = [1, 1]} : vector<2x128xf32> to vector<2x32xf32>
      %65 = arith.negf %64 : vector<2x32xf32>
      %66 = math.exp %65 : vector<2x32xf32>
      %cst_31 = arith.constant 1.000000e+00 : f32
      %67 = vector.broadcast %cst_31 : f32 to vector<2x32xf32>
      %68 = arith.addf %67, %66 : vector<2x32xf32>
      %69 = arith.divf %67, %68 : vector<2x32xf32>
      %70 = vector.extract_strided_slice %43 {offsets = [0, 32], sizes = [2, 32], strides = [1, 1]} : vector<2x128xf32> to vector<2x32xf32>
      %71 = arith.negf %70 : vector<2x32xf32>
      %72 = math.exp %71 : vector<2x32xf32>
      %cst_32 = arith.constant 1.000000e+00 : f32
      %73 = vector.broadcast %cst_32 : f32 to vector<2x32xf32>
      %74 = arith.addf %73, %72 : vector<2x32xf32>
      %75 = arith.divf %73, %74 : vector<2x32xf32>
      %76 = vector.extract_strided_slice %43 {offsets = [0, 64], sizes = [2, 32], strides = [1, 1]} : vector<2x128xf32> to vector<2x32xf32>
      %77 = math.tanh %76 : vector<2x32xf32>
      %78 = vector.extract_strided_slice %43 {offsets = [0, 96], sizes = [2, 32], strides = [1, 1]} : vector<2x128xf32> to vector<2x32xf32>
      %79 = arith.negf %78 : vector<2x32xf32>
      %80 = math.exp %79 : vector<2x32xf32>
      %cst_33 = arith.constant 1.000000e+00 : f32
      %81 = vector.broadcast %cst_33 : f32 to vector<2x32xf32>
      %82 = arith.addf %81, %80 : vector<2x32xf32>
      %83 = arith.divf %81, %82 : vector<2x32xf32>
      %84 = arith.mulf %55, %arg10 : vector<2x32xf32>
      %85 = arith.mulf %49, %57 : vector<2x32xf32>
      %86 = arith.addf %84, %85 : vector<2x32xf32>
      %87 = math.tanh %86 : vector<2x32xf32>
      %88 = arith.mulf %63, %87 : vector<2x32xf32>
      %89 = arith.mulf %75, %arg12 : vector<2x32xf32>
      %90 = arith.mulf %69, %77 : vector<2x32xf32>
      %91 = arith.addf %89, %90 : vector<2x32xf32>
      %92 = math.tanh %91 : vector<2x32xf32>
      %93 = arith.mulf %83, %92 : vector<2x32xf32>
      %94 = vector.broadcast %36 : vector<2x1xf32> to vector<2x32xf32>
      %95 = arith.mulf %94, %88 : vector<2x32xf32>
      %96 = arith.index_cast %arg8 : i32 to index
      %c0_34 = arith.constant 0 : index
      %c0_35 = arith.constant 0 : index
      %97 = vector.load %arg6[%96, %c0_34, %c0_35] : memref<8x2x32xf32, #tpu.memory_space<vmem>>, vector<1x2x32xf32>
      %98 = vector.shape_cast %97 : vector<1x2x32xf32> to vector<2x32xf32>
      %99 = vector.shape_cast %95 : vector<2x32xf32> to vector<1x2x32xf32>
      tpu.vector_store %arg6[%96, %c0_34, %c0_35], %99 {strides = array<i32>} : memref<8x2x32xf32, #tpu.memory_space<vmem>>, vector<1x2x32xf32>,
      %100 = vector.broadcast %39 : vector<2x1xf32> to vector<2x32xf32>
      %101 = arith.mulf %100, %93 : vector<2x32xf32>
      %102 = arith.index_cast %25 : i32 to index
      %c0_36 = arith.constant 0 : index
      %c0_37 = arith.constant 0 : index
      %103 = vector.load %arg7[%102, %c0_36, %c0_37] : memref<8x2x32xf32, #tpu.memory_space<vmem>>, vector<1x2x32xf32>
      %104 = vector.shape_cast %103 : vector<1x2x32xf32> to vector<2x32xf32>
      %105 = vector.shape_cast %101 : vector<2x32xf32> to vector<1x2x32xf32>
      tpu.vector_store %arg7[%102, %c0_36, %c0_37], %105 {strides = array<i32>} : memref<8x2x32xf32, #tpu.memory_space<vmem>>, vector<1x2x32xf32>,
      %106 = vector.broadcast %36 : vector<2x1xf32> to vector<2x32xf32>
      %107 = arith.mulf %106, %88 : vector<2x32xf32>
      %cst_38 = arith.constant 1.000000e+00 : f32
      %108 = vector.broadcast %cst_38 : f32 to vector<2x1xf32>
      %109 = arith.subf %108, %36 : vector<2x1xf32>
      %110 = vector.broadcast %109 : vector<2x1xf32> to vector<2x32xf32>
      %111 = arith.mulf %110, %arg9 : vector<2x32xf32>
      %112 = arith.addf %107, %111 : vector<2x32xf32>
      %113 = vector.broadcast %36 : vector<2x1xf32> to vector<2x32xf32>
      %114 = arith.mulf %113, %86 : vector<2x32xf32>
      %cst_39 = arith.constant 1.000000e+00 : f32
      %115 = vector.broadcast %cst_39 : f32 to vector<2x1xf32>
      %116 = arith.subf %115, %36 : vector<2x1xf32>
      %117 = vector.broadcast %116 : vector<2x1xf32> to vector<2x32xf32>
      %118 = arith.mulf %117, %arg10 : vector<2x32xf32>
      %119 = arith.addf %114, %118 : vector<2x32xf32>
      %120 = vector.broadcast %39 : vector<2x1xf32> to vector<2x32xf32>
      %121 = arith.mulf %120, %93 : vector<2x32xf32>
      %cst_40 = arith.constant 1.000000e+00 : f32
      %122 = vector.broadcast %cst_40 : f32 to vector<2x1xf32>
      %123 = arith.subf %122, %39 : vector<2x1xf32>
      %124 = vector.broadcast %123 : vector<2x1xf32> to vector<2x32xf32>
      %125 = arith.mulf %124, %arg11 : vector<2x32xf32>
      %126 = arith.addf %121, %125 : vector<2x32xf32>
      %127 = vector.broadcast %39 : vector<2x1xf32> to vector<2x32xf32>
      %128 = arith.mulf %127, %91 : vector<2x32xf32>
      %cst_41 = arith.constant 1.000000e+00 : f32
      %129 = vector.broadcast %cst_41 : f32 to vector<2x1xf32>
      %130 = arith.subf %129, %39 : vector<2x1xf32>
      %131 = vector.broadcast %130 : vector<2x1xf32> to vector<2x32xf32>
      %132 = arith.mulf %131, %arg12 : vector<2x32xf32>
      %133 = arith.addf %128, %132 : vector<2x32xf32>
      scf.yield %112, %119, %126, %133 : vector<2x32xf32>, vector<2x32xf32>, vector<2x32xf32>, vector<2x32xf32>
    }
    %c8_i32_3 = arith.constant 8 : i32
    %c0_4 = arith.constant 0 : index
    %c0_5 = arith.constant 0 : index
    %c0_6 = arith.constant 0 : index
    %5 = vector.load %arg6[%c0_4, %c0_5, %c0_6] : memref<8x2x32xf32, #tpu.memory_space<vmem>>, vector<8x2x32xf32>
    %c0_7 = arith.constant 0 : index
    %c0_8 = arith.constant 0 : index
    %c0_9 = arith.constant 0 : index
    %6 = vector.load %arg7[%c0_7, %c0_8, %c0_9] : memref<8x2x32xf32, #tpu.memory_space<vmem>>, vector<8x2x32xf32>
    %7 = tpu.concatenate %5, %6 in 2 : vector<8x2x32xf32>, vector<8x2x32xf32> -> vector<8x2x64xf32>
    %cst_10 = arith.constant dense<0.000000e+00> : vector<8x2xf32>
    %8 = vector.multi_reduction <add>, %7, %cst_10 [2] : vector<8x2x64xf32> to vector<8x2xf32>
    %9 = vector.shape_cast %8 : vector<8x2xf32> to vector<8x2x1xf32>
    %cst_11 = arith.constant 6.400000e+01 : f32
    %10 = vector.broadcast %cst_11 : f32 to vector<8x2x1xf32>
    %11 = arith.divf %9, %10 : vector<8x2x1xf32>
    %12 = vector.broadcast %11 : vector<8x2x1xf32> to vector<8x2x64xf32>
    %13 = arith.subf %7, %12 : vector<8x2x64xf32>
    %14 = arith.mulf %13, %13 : vector<8x2x64xf32>
    %cst_12 = arith.constant dense<0.000000e+00> : vector<8x2xf32>
    %15 = vector.multi_reduction <add>, %14, %cst_12 [2] : vector<8x2x64xf32> to vector<8x2xf32>
    %16 = vector.shape_cast %15 : vector<8x2xf32> to vector<8x2x1xf32>
    %cst_13 = arith.constant 6.400000e+01 : f32
    %17 = vector.broadcast %cst_13 : f32 to vector<8x2x1xf32>
    %18 = arith.divf %16, %17 : vector<8x2x1xf32>
    %cst_14 = arith.constant 9.99999974E-6 : f32
    %19 = vector.broadcast %cst_14 : f32 to vector<8x2x1xf32>
    %20 = arith.addf %18, %19 : vector<8x2x1xf32>
    %21 = math.rsqrt %20 : vector<8x2x1xf32>
    %22 = vector.broadcast %21 : vector<8x2x1xf32> to vector<8x2x64xf32>
    %23 = arith.mulf %13, %22 : vector<8x2x64xf32>
    %c0_15 = arith.constant 0 : index
    %c0_16 = arith.constant 0 : index
    %c0_17 = arith.constant 0 : index
    %24 = vector.load %arg5[%c0_15, %c0_16, %c0_17] : memref<8x2x64xf32, #tpu.memory_space<vmem>>, vector<8x2x64xf32>
    tpu.vector_store %arg5[%c0_15, %c0_16, %c0_17], %23 {strides = array<i32>} : memref<8x2x64xf32, #tpu.memory_space<vmem>>, vector<8x2x64xf32>,
    return
  }
  func.func @transform_0(%arg0: i32) -> (i32, i32, i32) {
    %c0_i32 = arith.constant 0 : i32
    %c0_i32_0 = arith.constant 0 : i32
    %c0_i32_1 = arith.constant 0 : i32
    %c0_i32_2 = arith.constant 0 : i32
    return %c0_i32, %c0_i32_0, %c0_i32_1 : i32, i32, i32
  }
  func.func @transform_1(%arg0: i32) -> (i32, i32, i32) {
    %c0_i32 = arith.constant 0 : i32
    %c0_i32_0 = arith.constant 0 : i32
    %c0_i32_1 = arith.constant 0 : i32
    %c0_i32_2 = arith.constant 0 : i32
    return %c0_i32, %c0_i32_0, %c0_i32_1 : i32, i32, i32
  }
  func.func @transform_2(%arg0: i32) -> (i32, i32) {
    %c0_i32 = arith.constant 0 : i32
    %c0_i32_0 = arith.constant 0 : i32
    %c0_i32_1 = arith.constant 0 : i32
    return %c0_i32, %c0_i32_0 : i32, i32
  }
  func.func @transform_3(%arg0: i32) -> (i32, i32) {
    %c0_i32 = arith.constant 0 : i32
    %c0_i32_0 = arith.constant 0 : i32
    %c0_i32_1 = arith.constant 0 : i32
    return %c0_i32, %c0_i32_0 : i32, i32
  }
  func.func @transform_4(%arg0: i32) -> (i32, i32, i32) {
    %c0_i32 = arith.constant 0 : i32
    %c0_i32_0 = arith.constant 0 : i32
    %c0_i32_1 = arith.constant 0 : i32
    %c0_i32_2 = arith.constant 0 : i32
    return %c0_i32, %c0_i32_0, %c0_i32_1 : i32, i32, i32
  }
}

module attributes {stable_mosaic.version = 11 : i64} {
  func.func @kernel(%arg0: i32, %arg1: memref<8x2x256xf32, #tpu.memory_space<vmem>>, %arg2: memref<8x2x1xf32, #tpu.memory_space<vmem>>, %arg3: memref<32x128xf32, #tpu.memory_space<vmem>>, %arg4: memref<32x128xf32, #tpu.memory_space<vmem>>, %arg5: memref<8x2x64xf32, #tpu.memory_space<vmem>>, %arg6: memref<8x2x64xf32, #tpu.memory_space<vmem>>, %arg7: memref<8x2x32xf32, #tpu.memory_space<vmem>>, %arg8: memref<8x2x32xf32, #tpu.memory_space<vmem>>) attributes {dimension_semantics = [#tpu.dimension_semantics<arbitrary>], iteration_bounds = array<i64: 1>, scalar_prefetch = 0 : i64, scratch_operands = 2 : i64, tpu.core_type = #tpu.core_type<tc>, window_params = [{pipeline_mode = #tpu.pipeline_mode<synchronous>, transform_indices = @transform_0, window_bounds = array<i64: 8, 2, 256>}, {pipeline_mode = #tpu.pipeline_mode<synchronous>, transform_indices = @transform_1, window_bounds = array<i64: 8, 2, 1>}, {pipeline_mode = #tpu.pipeline_mode<synchronous>, transform_indices = @transform_2, window_bounds = array<i64: 32, 128>}, {pipeline_mode = #tpu.pipeline_mode<synchronous>, transform_indices = @transform_3, window_bounds = array<i64: 32, 128>}, {pipeline_mode = #tpu.pipeline_mode<synchronous>, transform_indices = @transform_4, window_bounds = array<i64: 8, 2, 64>}, {pipeline_mode = #tpu.pipeline_mode<synchronous>, transform_indices = @transform_5, window_bounds = array<i64: 8, 2, 64>}]} {
    %c0 = arith.constant 0 : index
    %c0_0 = arith.constant 0 : index
    %0 = vector.load %arg3[%c0, %c0_0] : memref<32x128xf32, #tpu.memory_space<vmem>>, vector<32x128xf32>
    %c0_1 = arith.constant 0 : index
    %c0_2 = arith.constant 0 : index
    %1 = vector.load %arg4[%c0_1, %c0_2] : memref<32x128xf32, #tpu.memory_space<vmem>>, vector<32x128xf32>
    %cst = arith.constant 0.000000e+00 : f32
    %2 = vector.broadcast %cst : f32 to vector<2x32xf32>
    %c0_i32 = arith.constant 0 : i32
    %c8_i32 = arith.constant 8 : i32
    %3 = arith.addi %c0_i32, %c8_i32 : i32
    %c1_i32 = arith.constant 1 : i32
    %4:4 = scf.for %arg9 = %c0_i32 to %3 step %c1_i32 iter_args(%arg10 = %2, %arg11 = %2, %arg12 = %2, %arg13 = %2) -> (vector<2x32xf32>, vector<2x32xf32>, vector<2x32xf32>, vector<2x32xf32>)  : i32 {
      %c7_i32 = arith.constant 7 : i32
      %32 = arith.subi %c7_i32, %arg9 : i32
      %33 = arith.index_cast %arg9 : i32 to index
      %c0_25 = arith.constant 0 : index
      %c0_26 = arith.constant 0 : index
      %34 = vector.load %arg1[%33, %c0_25, %c0_26] : memref<8x2x256xf32, #tpu.memory_space<vmem>>, vector<1x2x256xf32>
      %35 = vector.shape_cast %34 : vector<1x2x256xf32> to vector<2x256xf32>
      %36 = vector.extract_strided_slice %35 {offsets = [0, 0], sizes = [2, 128], strides = [1, 1]} : vector<2x256xf32> to vector<2x128xf32>
      %37 = arith.index_cast %32 : i32 to index
      %c0_27 = arith.constant 0 : index
      %c0_28 = arith.constant 0 : index
      %38 = vector.load %arg1[%37, %c0_27, %c0_28] : memref<8x2x256xf32, #tpu.memory_space<vmem>>, vector<1x2x256xf32>
      %39 = vector.shape_cast %38 : vector<1x2x256xf32> to vector<2x256xf32>
      %40 = vector.extract_strided_slice %39 {offsets = [0, 128], sizes = [2, 128], strides = [1, 1]} : vector<2x256xf32> to vector<2x128xf32>
      %41 = arith.index_cast %arg9 : i32 to index
      %c0_29 = arith.constant 0 : index
      %c0_30 = arith.constant 0 : index
      %42 = vector.load %arg2[%41, %c0_29, %c0_30] : memref<8x2x1xf32, #tpu.memory_space<vmem>>, vector<1x2x1xf32>
      %43 = vector.shape_cast %42 : vector<1x2x1xf32> to vector<2x1xf32>
      %44 = arith.index_cast %32 : i32 to index
      %c0_31 = arith.constant 0 : index
      %c0_32 = arith.constant 0 : index
      %45 = vector.load %arg2[%44, %c0_31, %c0_32] : memref<8x2x1xf32, #tpu.memory_space<vmem>>, vector<1x2x1xf32>
      %46 = vector.shape_cast %45 : vector<1x2x1xf32> to vector<2x1xf32>
      %cst_33 = arith.constant dense<0.000000e+00> : vector<2x128xf32>
      %47 = tpu.matmul %arg10, %0, %cst_33 {dimension_numbers = #tpu.dot_dimension_numbers<[1], [0], [0], [1], [0, 0, 1, 1], [], []>} : vector<2x32xf32>, vector<32x128xf32>, vector<2x128xf32> -> vector<2x128xf32>
      %48 = arith.addf %36, %47 : vector<2x128xf32>
      %cst_34 = arith.constant dense<0.000000e+00> : vector<2x128xf32>
      %49 = tpu.matmul %arg12, %1, %cst_34 {dimension_numbers = #tpu.dot_dimension_numbers<[1], [0], [0], [1], [0, 0, 1, 1], [], []>} : vector<2x32xf32>, vector<32x128xf32>, vector<2x128xf32> -> vector<2x128xf32>
      %50 = arith.addf %40, %49 : vector<2x128xf32>
      %51 = vector.extract_strided_slice %48 {offsets = [0, 0], sizes = [2, 32], strides = [1, 1]} : vector<2x128xf32> to vector<2x32xf32>
      %52 = arith.negf %51 : vector<2x32xf32>
      %53 = math.exp %52 : vector<2x32xf32>
      %cst_35 = arith.constant 1.000000e+00 : f32
      %54 = vector.broadcast %cst_35 : f32 to vector<2x32xf32>
      %55 = arith.addf %54, %53 : vector<2x32xf32>
      %56 = arith.divf %54, %55 : vector<2x32xf32>
      %57 = vector.extract_strided_slice %48 {offsets = [0, 32], sizes = [2, 32], strides = [1, 1]} : vector<2x128xf32> to vector<2x32xf32>
      %58 = arith.negf %57 : vector<2x32xf32>
      %59 = math.exp %58 : vector<2x32xf32>
      %cst_36 = arith.constant 1.000000e+00 : f32
      %60 = vector.broadcast %cst_36 : f32 to vector<2x32xf32>
      %61 = arith.addf %60, %59 : vector<2x32xf32>
      %62 = arith.divf %60, %61 : vector<2x32xf32>
      %63 = vector.extract_strided_slice %48 {offsets = [0, 64], sizes = [2, 32], strides = [1, 1]} : vector<2x128xf32> to vector<2x32xf32>
      %64 = math.tanh %63 : vector<2x32xf32>
      %65 = vector.extract_strided_slice %48 {offsets = [0, 96], sizes = [2, 32], strides = [1, 1]} : vector<2x128xf32> to vector<2x32xf32>
      %66 = arith.negf %65 : vector<2x32xf32>
      %67 = math.exp %66 : vector<2x32xf32>
      %cst_37 = arith.constant 1.000000e+00 : f32
      %68 = vector.broadcast %cst_37 : f32 to vector<2x32xf32>
      %69 = arith.addf %68, %67 : vector<2x32xf32>
      %70 = arith.divf %68, %69 : vector<2x32xf32>
      %71 = vector.extract_strided_slice %50 {offsets = [0, 0], sizes = [2, 32], strides = [1, 1]} : vector<2x128xf32> to vector<2x32xf32>
      %72 = arith.negf %71 : vector<2x32xf32>
      %73 = math.exp %72 : vector<2x32xf32>
      %cst_38 = arith.constant 1.000000e+00 : f32
      %74 = vector.broadcast %cst_38 : f32 to vector<2x32xf32>
      %75 = arith.addf %74, %73 : vector<2x32xf32>
      %76 = arith.divf %74, %75 : vector<2x32xf32>
      %77 = vector.extract_strided_slice %50 {offsets = [0, 32], sizes = [2, 32], strides = [1, 1]} : vector<2x128xf32> to vector<2x32xf32>
      %78 = arith.negf %77 : vector<2x32xf32>
      %79 = math.exp %78 : vector<2x32xf32>
      %cst_39 = arith.constant 1.000000e+00 : f32
      %80 = vector.broadcast %cst_39 : f32 to vector<2x32xf32>
      %81 = arith.addf %80, %79 : vector<2x32xf32>
      %82 = arith.divf %80, %81 : vector<2x32xf32>
      %83 = vector.extract_strided_slice %50 {offsets = [0, 64], sizes = [2, 32], strides = [1, 1]} : vector<2x128xf32> to vector<2x32xf32>
      %84 = math.tanh %83 : vector<2x32xf32>
      %85 = vector.extract_strided_slice %50 {offsets = [0, 96], sizes = [2, 32], strides = [1, 1]} : vector<2x128xf32> to vector<2x32xf32>
      %86 = arith.negf %85 : vector<2x32xf32>
      %87 = math.exp %86 : vector<2x32xf32>
      %cst_40 = arith.constant 1.000000e+00 : f32
      %88 = vector.broadcast %cst_40 : f32 to vector<2x32xf32>
      %89 = arith.addf %88, %87 : vector<2x32xf32>
      %90 = arith.divf %88, %89 : vector<2x32xf32>
      %91 = arith.mulf %62, %arg11 : vector<2x32xf32>
      %92 = arith.mulf %56, %64 : vector<2x32xf32>
      %93 = arith.addf %91, %92 : vector<2x32xf32>
      %94 = math.tanh %93 : vector<2x32xf32>
      %95 = arith.mulf %70, %94 : vector<2x32xf32>
      %96 = arith.mulf %82, %arg13 : vector<2x32xf32>
      %97 = arith.mulf %76, %84 : vector<2x32xf32>
      %98 = arith.addf %96, %97 : vector<2x32xf32>
      %99 = math.tanh %98 : vector<2x32xf32>
      %100 = arith.mulf %90, %99 : vector<2x32xf32>
      %101 = vector.broadcast %43 : vector<2x1xf32> to vector<2x32xf32>
      %102 = arith.mulf %101, %95 : vector<2x32xf32>
      %103 = arith.index_cast %arg9 : i32 to index
      %c0_41 = arith.constant 0 : index
      %c0_42 = arith.constant 0 : index
      %104 = vector.load %arg7[%103, %c0_41, %c0_42] : memref<8x2x32xf32, #tpu.memory_space<vmem>>, vector<1x2x32xf32>
      %105 = vector.shape_cast %104 : vector<1x2x32xf32> to vector<2x32xf32>
      %106 = vector.shape_cast %102 : vector<2x32xf32> to vector<1x2x32xf32>
      tpu.vector_store %arg7[%103, %c0_41, %c0_42], %106 {strides = array<i32>} : memref<8x2x32xf32, #tpu.memory_space<vmem>>, vector<1x2x32xf32>,
      %107 = vector.broadcast %46 : vector<2x1xf32> to vector<2x32xf32>
      %108 = arith.mulf %107, %100 : vector<2x32xf32>
      %109 = arith.index_cast %32 : i32 to index
      %c0_43 = arith.constant 0 : index
      %c0_44 = arith.constant 0 : index
      %110 = vector.load %arg8[%109, %c0_43, %c0_44] : memref<8x2x32xf32, #tpu.memory_space<vmem>>, vector<1x2x32xf32>
      %111 = vector.shape_cast %110 : vector<1x2x32xf32> to vector<2x32xf32>
      %112 = vector.shape_cast %108 : vector<2x32xf32> to vector<1x2x32xf32>
      tpu.vector_store %arg8[%109, %c0_43, %c0_44], %112 {strides = array<i32>} : memref<8x2x32xf32, #tpu.memory_space<vmem>>, vector<1x2x32xf32>,
      %113 = vector.broadcast %43 : vector<2x1xf32> to vector<2x32xf32>
      %114 = arith.mulf %113, %95 : vector<2x32xf32>
      %cst_45 = arith.constant 1.000000e+00 : f32
      %115 = vector.broadcast %cst_45 : f32 to vector<2x1xf32>
      %116 = arith.subf %115, %43 : vector<2x1xf32>
      %117 = vector.broadcast %116 : vector<2x1xf32> to vector<2x32xf32>
      %118 = arith.mulf %117, %arg10 : vector<2x32xf32>
      %119 = arith.addf %114, %118 : vector<2x32xf32>
      %120 = vector.broadcast %43 : vector<2x1xf32> to vector<2x32xf32>
      %121 = arith.mulf %120, %93 : vector<2x32xf32>
      %cst_46 = arith.constant 1.000000e+00 : f32
      %122 = vector.broadcast %cst_46 : f32 to vector<2x1xf32>
      %123 = arith.subf %122, %43 : vector<2x1xf32>
      %124 = vector.broadcast %123 : vector<2x1xf32> to vector<2x32xf32>
      %125 = arith.mulf %124, %arg11 : vector<2x32xf32>
      %126 = arith.addf %121, %125 : vector<2x32xf32>
      %127 = vector.broadcast %46 : vector<2x1xf32> to vector<2x32xf32>
      %128 = arith.mulf %127, %100 : vector<2x32xf32>
      %cst_47 = arith.constant 1.000000e+00 : f32
      %129 = vector.broadcast %cst_47 : f32 to vector<2x1xf32>
      %130 = arith.subf %129, %46 : vector<2x1xf32>
      %131 = vector.broadcast %130 : vector<2x1xf32> to vector<2x32xf32>
      %132 = arith.mulf %131, %arg12 : vector<2x32xf32>
      %133 = arith.addf %128, %132 : vector<2x32xf32>
      %134 = vector.broadcast %46 : vector<2x1xf32> to vector<2x32xf32>
      %135 = arith.mulf %134, %98 : vector<2x32xf32>
      %cst_48 = arith.constant 1.000000e+00 : f32
      %136 = vector.broadcast %cst_48 : f32 to vector<2x1xf32>
      %137 = arith.subf %136, %46 : vector<2x1xf32>
      %138 = vector.broadcast %137 : vector<2x1xf32> to vector<2x32xf32>
      %139 = arith.mulf %138, %arg13 : vector<2x32xf32>
      %140 = arith.addf %135, %139 : vector<2x32xf32>
      scf.yield %119, %126, %133, %140 : vector<2x32xf32>, vector<2x32xf32>, vector<2x32xf32>, vector<2x32xf32>
    }
    %c8_i32_3 = arith.constant 8 : i32
    %c0_4 = arith.constant 0 : index
    %c0_5 = arith.constant 0 : index
    %c0_6 = arith.constant 0 : index
    %5 = vector.load %arg7[%c0_4, %c0_5, %c0_6] : memref<8x2x32xf32, #tpu.memory_space<vmem>>, vector<8x2x32xf32>
    %c0_7 = arith.constant 0 : index
    %c0_8 = arith.constant 0 : index
    %c0_9 = arith.constant 0 : index
    %6 = vector.load %arg8[%c0_7, %c0_8, %c0_9] : memref<8x2x32xf32, #tpu.memory_space<vmem>>, vector<8x2x32xf32>
    %7 = tpu.concatenate %5, %6 in 2 : vector<8x2x32xf32>, vector<8x2x32xf32> -> vector<8x2x64xf32>
    %c0_10 = arith.constant 0 : index
    %c0_11 = arith.constant 0 : index
    %c0_12 = arith.constant 0 : index
    %8 = vector.load %arg2[%c0_10, %c0_11, %c0_12] : memref<8x2x1xf32, #tpu.memory_space<vmem>>, vector<8x2x1xf32>
    %c0_13 = arith.constant 0 : index
    %c0_14 = arith.constant 0 : index
    %c0_15 = arith.constant 0 : index
    %9 = vector.load %arg5[%c0_13, %c0_14, %c0_15] : memref<8x2x64xf32, #tpu.memory_space<vmem>>, vector<8x2x64xf32>
    %10 = vector.broadcast %8 : vector<8x2x1xf32> to vector<8x2x64xf32>
    %11 = arith.mulf %10, %9 : vector<8x2x64xf32>
    %12 = arith.addf %7, %11 : vector<8x2x64xf32>
    %cst_16 = arith.constant 0.707106769 : f32
    %13 = vector.broadcast %cst_16 : f32 to vector<8x2x64xf32>
    %14 = arith.mulf %13, %12 : vector<8x2x64xf32>
    %cst_17 = arith.constant dense<0.000000e+00> : vector<8x2xf32>
    %15 = vector.multi_reduction <add>, %14, %cst_17 [2] : vector<8x2x64xf32> to vector<8x2xf32>
    %16 = vector.shape_cast %15 : vector<8x2xf32> to vector<8x2x1xf32>
    %cst_18 = arith.constant 6.400000e+01 : f32
    %17 = vector.broadcast %cst_18 : f32 to vector<8x2x1xf32>
    %18 = arith.divf %16, %17 : vector<8x2x1xf32>
    %19 = vector.broadcast %18 : vector<8x2x1xf32> to vector<8x2x64xf32>
    %20 = arith.subf %14, %19 : vector<8x2x64xf32>
    %21 = arith.mulf %20, %20 : vector<8x2x64xf32>
    %cst_19 = arith.constant dense<0.000000e+00> : vector<8x2xf32>
    %22 = vector.multi_reduction <add>, %21, %cst_19 [2] : vector<8x2x64xf32> to vector<8x2xf32>
    %23 = vector.shape_cast %22 : vector<8x2xf32> to vector<8x2x1xf32>
    %cst_20 = arith.constant 6.400000e+01 : f32
    %24 = vector.broadcast %cst_20 : f32 to vector<8x2x1xf32>
    %25 = arith.divf %23, %24 : vector<8x2x1xf32>
    %cst_21 = arith.constant 9.99999974E-6 : f32
    %26 = vector.broadcast %cst_21 : f32 to vector<8x2x1xf32>
    %27 = arith.addf %25, %26 : vector<8x2x1xf32>
    %28 = math.rsqrt %27 : vector<8x2x1xf32>
    %29 = vector.broadcast %28 : vector<8x2x1xf32> to vector<8x2x64xf32>
    %30 = arith.mulf %20, %29 : vector<8x2x64xf32>
    %c0_22 = arith.constant 0 : index
    %c0_23 = arith.constant 0 : index
    %c0_24 = arith.constant 0 : index
    %31 = vector.load %arg6[%c0_22, %c0_23, %c0_24] : memref<8x2x64xf32, #tpu.memory_space<vmem>>, vector<8x2x64xf32>
    tpu.vector_store %arg6[%c0_22, %c0_23, %c0_24], %30 {strides = array<i32>} : memref<8x2x64xf32, #tpu.memory_space<vmem>>, vector<8x2x64xf32>,
    return
  }
  func.func @transform_0(%arg0: i32) -> (i32, i32, i32) {
    %c0_i32 = arith.constant 0 : i32
    %c0_i32_0 = arith.constant 0 : i32
    %c0_i32_1 = arith.constant 0 : i32
    %c0_i32_2 = arith.constant 0 : i32
    return %c0_i32, %c0_i32_0, %c0_i32_1 : i32, i32, i32
  }
  func.func @transform_1(%arg0: i32) -> (i32, i32, i32) {
    %c0_i32 = arith.constant 0 : i32
    %c0_i32_0 = arith.constant 0 : i32
    %c0_i32_1 = arith.constant 0 : i32
    %c0_i32_2 = arith.constant 0 : i32
    return %c0_i32, %c0_i32_0, %c0_i32_1 : i32, i32, i32
  }
  func.func @transform_2(%arg0: i32) -> (i32, i32) {
    %c0_i32 = arith.constant 0 : i32
    %c0_i32_0 = arith.constant 0 : i32
    %c0_i32_1 = arith.constant 0 : i32
    return %c0_i32, %c0_i32_0 : i32, i32
  }
  func.func @transform_3(%arg0: i32) -> (i32, i32) {
    %c0_i32 = arith.constant 0 : i32
    %c0_i32_0 = arith.constant 0 : i32
    %c0_i32_1 = arith.constant 0 : i32
    return %c0_i32, %c0_i32_0 : i32, i32
  }
  func.func @transform_4(%arg0: i32) -> (i32, i32, i32) {
    %c0_i32 = arith.constant 0 : i32
    %c0_i32_0 = arith.constant 0 : i32
    %c0_i32_1 = arith.constant 0 : i32
    %c0_i32_2 = arith.constant 0 : i32
    return %c0_i32, %c0_i32_0, %c0_i32_1 : i32, i32, i32
  }
  func.func @transform_5(%arg0: i32) -> (i32, i32, i32) {
    %c0_i32 = arith.constant 0 : i32
    %c0_i32_0 = arith.constant 0 : i32
    %c0_i32_1 = arith.constant 0 : i32
    %c0_i32_2 = arith.constant 0 : i32
    return %c0_i32, %c0_i32_0, %c0_i32_1 : i32, i32, i32
  }
}

module attributes {stable_mosaic.version = 11 : i64} {
  func.func @_proj_ln_kernel(%arg0: i32, %arg1: memref<16x64xf32, #tpu.memory_space<vmem>>, %arg2: memref<64x32xf32, #tpu.memory_space<vmem>>, %arg3: memref<1x32xf32, #tpu.memory_space<vmem>>, %arg4: memref<16x32xf32, #tpu.memory_space<vmem>>) attributes {dimension_semantics = [#tpu.dimension_semantics<parallel>], iteration_bounds = array<i64: 1>, scalar_prefetch = 0 : i64, scratch_operands = 0 : i64, tpu.core_type = #tpu.core_type<tc>, window_params = [{transform_indices = @transform_0, window_bounds = array<i64: 16, 64>}, {pipeline_mode = #tpu.pipeline_mode<synchronous>, transform_indices = @transform_1, window_bounds = array<i64: 64, 32>}, {pipeline_mode = #tpu.pipeline_mode<synchronous>, transform_indices = @transform_2, window_bounds = array<i64: 1, 32>}, {transform_indices = @transform_3, window_bounds = array<i64: 16, 32>}]} {
    %c0 = arith.constant 0 : index
    %c0_0 = arith.constant 0 : index
    %0 = vector.load %arg1[%c0, %c0_0] : memref<16x64xf32, #tpu.memory_space<vmem>>, vector<16x64xf32>
    %c0_1 = arith.constant 0 : index
    %c0_2 = arith.constant 0 : index
    %1 = vector.load %arg2[%c0_1, %c0_2] : memref<64x32xf32, #tpu.memory_space<vmem>>, vector<64x32xf32>
    %cst = arith.constant dense<0.000000e+00> : vector<16x32xf32>
    %2 = tpu.matmul %0, %1, %cst {dimension_numbers = #tpu.dot_dimension_numbers<[1], [0], [0], [1], [0, 0, 1, 1], [], []>} : vector<16x64xf32>, vector<64x32xf32>, vector<16x32xf32> -> vector<16x32xf32>
    %c0_3 = arith.constant 0 : index
    %c0_4 = arith.constant 0 : index
    %3 = vector.load %arg3[%c0_3, %c0_4] : memref<1x32xf32, #tpu.memory_space<vmem>>, vector<1x32xf32>
    %4 = vector.broadcast %3 : vector<1x32xf32> to vector<16x32xf32>
    %5 = arith.addf %2, %4 : vector<16x32xf32>
    %cst_5 = arith.constant dense<0.000000e+00> : vector<16xf32>
    %6 = vector.multi_reduction <add>, %5, %cst_5 [1] : vector<16x32xf32> to vector<16xf32>
    %7 = vector.shape_cast %6 : vector<16xf32> to vector<16x1xf32>
    %cst_6 = arith.constant 3.200000e+01 : f32
    %8 = vector.broadcast %cst_6 : f32 to vector<16x1xf32>
    %9 = arith.divf %7, %8 : vector<16x1xf32>
    %10 = vector.broadcast %9 : vector<16x1xf32> to vector<16x32xf32>
    %11 = arith.subf %5, %10 : vector<16x32xf32>
    %12 = arith.mulf %11, %11 : vector<16x32xf32>
    %cst_7 = arith.constant dense<0.000000e+00> : vector<16xf32>
    %13 = vector.multi_reduction <add>, %12, %cst_7 [1] : vector<16x32xf32> to vector<16xf32>
    %14 = vector.shape_cast %13 : vector<16xf32> to vector<16x1xf32>
    %cst_8 = arith.constant 3.200000e+01 : f32
    %15 = vector.broadcast %cst_8 : f32 to vector<16x1xf32>
    %16 = arith.divf %14, %15 : vector<16x1xf32>
    %cst_9 = arith.constant 9.99999974E-6 : f32
    %17 = vector.broadcast %cst_9 : f32 to vector<16x1xf32>
    %18 = arith.addf %16, %17 : vector<16x1xf32>
    %19 = math.rsqrt %18 : vector<16x1xf32>
    %20 = vector.broadcast %19 : vector<16x1xf32> to vector<16x32xf32>
    %21 = arith.mulf %11, %20 : vector<16x32xf32>
    %c0_10 = arith.constant 0 : index
    %c0_11 = arith.constant 0 : index
    %22 = vector.load %arg4[%c0_10, %c0_11] : memref<16x32xf32, #tpu.memory_space<vmem>>, vector<16x32xf32>
    tpu.vector_store %arg4[%c0_10, %c0_11], %21 {strides = array<i32>} : memref<16x32xf32, #tpu.memory_space<vmem>>, vector<16x32xf32>,
    return
  }
  func.func @transform_0(%arg0: i32) -> (i32, i32) {
    %c0_i32 = arith.constant 0 : i32
    %c0_i32_0 = arith.constant 0 : i32
    return %arg0, %c0_i32 : i32, i32
  }
  func.func @transform_1(%arg0: i32) -> (i32, i32) {
    %c0_i32 = arith.constant 0 : i32
    %c0_i32_0 = arith.constant 0 : i32
    %c0_i32_1 = arith.constant 0 : i32
    return %c0_i32, %c0_i32_0 : i32, i32
  }
  func.func @transform_2(%arg0: i32) -> (i32, i32) {
    %c0_i32 = arith.constant 0 : i32
    %c0_i32_0 = arith.constant 0 : i32
    %c0_i32_1 = arith.constant 0 : i32
    return %c0_i32, %c0_i32_0 : i32, i32
  }
  func.func @transform_3(%arg0: i32) -> (i32, i32) {
    %c0_i32 = arith.constant 0 : i32
    %c0_i32_0 = arith.constant 0 : i32
    return %arg0, %c0_i32 : i32, i32
  }
}

</mosaic_0001>

<bundles_post_ra>
// kernel: text_encoder_forward.7
= control target key start
LH: loop header
LB: loop body
LE: loop exit
PB: predicated region body
PF: predicated region fallthrough
CT: control target
= control target key end

     0   :  { %v143_v3 = vmov 0.0   ;;  %vm36_vm0 = vcmask 261120   ;;  %v26_v15 = vlaneseq  ;;  %s209_s1 = inlined_call_operand.vmem [shape: f32[32,256], index: 1, kind: input, shape index: {}]   ;;  %s210_s0 = inlined_call_operand.vmem [shape: f32[16,32], index: 0, kind: input, shape index: {}]   ;;  %s211_s2 = inlined_call_operand.vmem [shape: f32[1,256], index: 2, kind: input, shape index: {}]   ;;  %s212_s3 = inlined_call_operand.vmem [shape: f32[16,256], index: 3, kind: output, shape index: {}]  }
   0x1   :  { %v17_v0 = vld [vmem:[%s209_s1 + $0x8] sm:$0xff]  ;;  %v19_v1 = vld [vmem:[%s209_s1 + $0x18] sm:$0xff]  ;;  %v16_v2 = vld [vmem:[%s209_s1] sm:$0xff]  ;;  %107 = vmatprep.mubr.f32.mxu0 %v143_v3  ;;  %113 = vmatprep.mubr.f32.mxu1 %v143_v3 }
   0x2   :  { %v130_v4 = vpack.c.bf16 %v19_v1, %v17_v0  ;;  %v18_v5 = vld [vmem:[%s209_s1 + $0x10] sm:$0xff]  ;;  %v21_v6 = vld [vmem:[%s209_s1 + $0x28] sm:$0xff]  ;;  %v23_v7 = vld [vmem:[%s209_s1 + $0x38] sm:$0xff]  ;;  %v27_v16 = vshrl.u32 %v26_v15, 7 }
   0x3   :  { %v132_v8 = vpack.c.bf16 %v18_v5, %v16_v2  ;;  %v134_v9 = vpack.c.bf16 %v23_v7, %v21_v6  ;;  %v20_v10 = vld [vmem:[%s209_s1 + $0x20] sm:$0xff]  ;;  %v22_v11 = vld [vmem:[%s209_s1 + $0x30] sm:$0xff]  ;;  %v15_v14 = vld [vmem:[%s210_s0 + $0x8] sm:$0xff] }
   0x4   :  { %131 = vmatprep.subr.bf16.mxu0 %v130_v4  ;;  %138 = vmatprep.subr.bf16.mxu1 %v130_v4  ;;  %v136_v12 = vpack.c.bf16 %v22_v11, %v20_v10  ;;  %v14_v13 = vld [vmem:[%s210_s0] sm:$0xff]  ;;  %v28_v17 = vsub.s32 0, %v27_v16  ;;  %v32_v19 = vsub.s32 1, %v27_v16 }
   0x5   :  { %133 = vmatpush1.bf16.msra.mxu0 %v132_v8  ;;  %140 = vmatpush1.bf16.msra.mxu1 %v132_v8  ;;  %v24_v18 = vld [vmem:[%s211_s2] sm:$0x3] }
   0x6   :  { %135 = vmatprep.subr.bf16.mxu0 %v134_v9  ;;  %139 = vmatprep.subr.bf16.mxu1 %v134_v9  ;;  %v29_v20 = vrot.slane %v24_v18, %v28_v17  ;;  %v33_v21 = vrot.slane %v24_v18, %v32_v19 }
   0x9   :  { %137 = vmatpush1.bf16.msra.mxu0 %v136_v12  ;;  %141 = vmatpush1.bf16.msra.mxu1 %v136_v12 }
   0xc   :  { %128 = vmatmul.mubr.msk.f32.vlgmr.msra.gmra.mrb[0].mxu0 %vm36_vm0, %v14_v13  ;;  %129 = vmatmul.mubr.msk.f32.vlgmr.msra.gmra.mrb[0].mxu1 %vm36_vm0, %v15_v14 }
  0xdf   :  { %v109_v22 = vpop.f32.mrb[0].mxu0  ;;  %v115_v23 = vpop.f32.mrb[0].mxu1 }
  0xe0   :  { %v110_v24 = vadd.f32 %v109_v22, %v29_v20  ;;  %v116_v25 = vadd.f32 %v115_v23, %v29_v20  ;;  %v111_v26 = vpop.f32.mrb[1].mxu0  ;;  %v117_v27 = vpop.f32.mrb[1].mxu1 }
  0xe1   :  { %v112_v28 = vadd.f32 %v111_v26, %v33_v21  ;;  %v118_v29 = vadd.f32 %v117_v27, %v33_v21 }
  0xe2   :  { %120 = vst [vmem:[%s212_s3] sm:$0xff] %v110_v24  ;;  %122 = vst [vmem:[%s212_s3 + $0x10] sm:$0xff] %v116_v25 }
  0xe3   :  { %121 = vst [vmem:[%s212_s3 + $0x8] sm:$0xff] %v112_v28  ;;  %123 = vst [vmem:[%s212_s3 + $0x18] sm:$0xff] %v118_v29 }

// kernel: text_encoder_forward.9
= control target key start
LH: loop header
LB: loop body
LE: loop exit
PB: predicated region body
PF: predicated region fallthrough
CT: control target
= control target key end

     0   :  { %v163_v3 = vmov 0.0   ;;  %vm44_vm0 = vcmask 523264   ;;  %v34_v27 = vlaneseq  ;;  %s253_s1 = inlined_call_operand.vmem [shape: f32[64,256], index: 1, kind: input, shape index: {}]   ;;  %s254_s0 = inlined_call_operand.vmem [shape: f32[16,64], index: 0, kind: input, shape index: {}]   ;;  %s255_s2 = inlined_call_operand.vmem [shape: f32[1,256], index: 2, kind: input, shape index: {}]   ;;  %s256_s3 = inlined_call_operand.vmem [shape: f32[16,256], index: 3, kind: output, shape index: {}]  }
   0x1   :  { %v17_v0 = vld [vmem:[%s253_s1 + $0x8] sm:$0xff]  ;;  %v19_v1 = vld [vmem:[%s253_s1 + $0x18] sm:$0xff]  ;;  %v16_v2 = vld [vmem:[%s253_s1] sm:$0xff]  ;;  %115 = vmatprep.mubr.f32.mxu0 %v163_v3  ;;  %121 = vmatprep.mubr.f32.mxu1 %v163_v3 }
   0x2   :  { %v138_v4 = vpack.c.bf16 %v19_v1, %v17_v0  ;;  %v18_v5 = vld [vmem:[%s253_s1 + $0x10] sm:$0xff]  ;;  %v21_v6 = vld [vmem:[%s253_s1 + $0x28] sm:$0xff]  ;;  %v23_v7 = vld [vmem:[%s253_s1 + $0x38] sm:$0xff]  ;;  %v35_v28 = vshrl.u32 %v34_v27, 7 }
   0x3   :  { %v140_v8 = vpack.c.bf16 %v18_v5, %v16_v2  ;;  %v142_v9 = vpack.c.bf16 %v23_v7, %v21_v6  ;;  %v20_v10 = vld [vmem:[%s253_s1 + $0x20] sm:$0xff]  ;;  %v22_v11 = vld [vmem:[%s253_s1 + $0x30] sm:$0xff]  ;;  %v25_v12 = vld [vmem:[%s253_s1 + $0x48] sm:$0xff] }
   0x4   :  { %139 = vmatprep.subr.bf16.mxu0 %v138_v4  ;;  %154 = vmatprep.subr.bf16.mxu1 %v138_v4  ;;  %v27_v13 = vld [vmem:[%s253_s1 + $0x58] sm:$0xff]  ;;  %v144_v14 = vpack.c.bf16 %v22_v11, %v20_v10  ;;  %v24_v16 = vld [vmem:[%s253_s1 + $0x40] sm:$0xff]  ;;  %v26_v17 = vld [vmem:[%s253_s1 + $0x50] sm:$0xff]  ;;  %v36_v29 = vsub.s32 0, %v35_v28  ;;  %v40_v31 = vsub.s32 1, %v35_v28 }
   0x5   :  { %141 = vmatpush1.bf16.msra.mxu0 %v140_v8  ;;  %158 = vmatpush1.bf16.msra.mxu1 %v140_v8  ;;  %v146_v15 = vpack.c.bf16 %v27_v13, %v25_v12  ;;  %v29_v18 = vld [vmem:[%s253_s1 + $0x68] sm:$0xff]  ;;  %v31_v19 = vld [vmem:[%s253_s1 + $0x78] sm:$0xff]  ;;  %v148_v20 = vpack.c.bf16 %v26_v17, %v24_v16  ;;  %v28_v22 = vld [vmem:[%s253_s1 + $0x60] sm:$0xff] }
   0x6   :  { %143 = vmatprep.subr.bf16.mxu0 %v142_v9  ;;  %155 = vmatprep.subr.bf16.mxu1 %v142_v9  ;;  %v150_v21 = vpack.c.bf16 %v31_v19, %v29_v18  ;;  %v30_v23 = vld [vmem:[%s253_s1 + $0x70] sm:$0xff]  ;;  %v14_v25 = vld [vmem:[%s254_s0] sm:$0xff]  ;;  %v15_v26 = vld [vmem:[%s254_s0 + $0x8] sm:$0xff] }
   0x7   :  { %v152_v24 = vpack.c.bf16 %v30_v23, %v28_v22  ;;  %v32_v30 = vld [vmem:[%s255_s2] sm:$0x3] }
   0x8   :  { %v37_v32 = vrot.slane %v32_v30, %v36_v29  ;;  %v41_v33 = vrot.slane %v32_v30, %v40_v31 }
   0x9   :  { %145 = vmatpush1.bf16.msra.mxu0 %v144_v14  ;;  %159 = vmatpush1.bf16.msra.mxu1 %v144_v14 }
   0xa   :  { %147 = vmatprep.subr.bf16.mxu0 %v146_v15  ;;  %156 = vmatprep.subr.bf16.mxu1 %v146_v15 }
   0xd   :  { %149 = vmatpush1.bf16.msra.mxu0 %v148_v20  ;;  %160 = vmatpush1.bf16.msra.mxu1 %v148_v20 }
   0xe   :  { %151 = vmatprep.subr.bf16.mxu0 %v150_v21  ;;  %157 = vmatprep.subr.bf16.mxu1 %v150_v21 }
  0x11   :  { %153 = vmatpush1.bf16.msra.mxu0 %v152_v24  ;;  %161 = vmatpush1.bf16.msra.mxu1 %v152_v24 }
  0x14   :  { %136 = vmatmul.mubr.msk.f32.vlgmr.msra.gmra.mrb[0].mxu0 %vm44_vm0, %v14_v25  ;;  %137 = vmatmul.mubr.msk.f32.vlgmr.msra.gmra.mrb[0].mxu1 %vm44_vm0, %v15_v26 }
  0xe7   :  { %v117_v34 = vpop.f32.mrb[0].mxu0  ;;  %v123_v35 = vpop.f32.mrb[0].mxu1 }
  0xe8   :  { %v118_v36 = vadd.f32 %v117_v34, %v37_v32  ;;  %v124_v37 = vadd.f32 %v123_v35, %v37_v32  ;;  %v119_v38 = vpop.f32.mrb[1].mxu0  ;;  %v125_v39 = vpop.f32.mrb[1].mxu1 }
  0xe9   :  { %v120_v40 = vadd.f32 %v119_v38, %v41_v33  ;;  %v126_v41 = vadd.f32 %v125_v39, %v41_v33 }
  0xea   :  { %128 = vst [vmem:[%s256_s3] sm:$0xff] %v118_v36  ;;  %130 = vst [vmem:[%s256_s3 + $0x10] sm:$0xff] %v124_v37 }
  0xeb   :  { %129 = vst [vmem:[%s256_s3 + $0x8] sm:$0xff] %v120_v40  ;;  %131 = vst [vmem:[%s256_s3 + $0x18] sm:$0xff] %v126_v41 }

// kernel: text_encoder_forward.8
= control target key start
LH: loop header
LB: loop body
LE: loop exit
PB: predicated region body
PF: predicated region fallthrough
CT: control target
= control target key end

     0   :  { %v808_v8 = vmov 0.0   ;;  %v810_v9 = vmov 0.0   ;;  %v812_v10 = vmov 0.0   ;;  %v814_v11 = vmov 0.0   ;;  %s998_s0 = inlined_call_operand.vmem [shape: f32[8,2,256], index: 0, kind: input, shape index: {}]   ;;  %s999_s1 = inlined_call_operand.vmem [shape: f32[8,2,1], index: 1, kind: input, shape index: {}]   ;;  %s1000_s2 = inlined_call_operand.vmem [shape: f32[32,128], index: 2, kind: input, shape index: {}]   ;;  %s1001_s3 = inlined_call_operand.vmem [shape: f32[32,128], index: 3, kind: input, shape index: {}]   ;;  %s1002_s4 = inlined_call_operand.vmem [shape: f32[8,2,64], index: 4, kind: output, shape index: {}]  }
   0x1   :  { %v771_v0 = vld [vmem:[%s1000_s2] sm:$0xff]  ;;  %v776_v1 = vld [vmem:[%s1000_s2 + $0x8] sm:$0xff]  ;;  %v781_v2 = vld [vmem:[%s1000_s2 + $0x10] sm:$0xff] }
   0x2   :  { %v786_v3 = vld [vmem:[%s1000_s2 + $0x18] sm:$0xff]  ;;  %v791_v4 = vld [vmem:[%s1001_s3] sm:$0xff]  ;;  %v796_v5 = vld [vmem:[%s1001_s3 + $0x8] sm:$0xff]  ;;  %s816_s2 = smov 0  }
   0x3   :  { %v801_v6 = vld [vmem:[%s1001_s3 + $0x10] sm:$0xff]  ;;  %v806_v7 = vld [vmem:[%s1001_s3 + $0x18] sm:$0xff] }
   0x4 LB: > { %v600_v12 = vpack.c.bf16 %v776_v1, %v771_v0  ;;  %v606_v13 = vpack.c.bf16 %v796_v5, %v791_v4  ;;  %v734_v14 = vmov 0.0|0.0   ;;  %v603_v15 = vpack.c.bf16 %v786_v3, %v781_v2  ;;  %s738_s3 = smov 32   ;;  %s35_s5 = ssub.s32 7, %s732_s2  ;;  %s732_s2 = sphi %s816_s2, %s30_s2   ;;  %v728_v11 = vphi %v814_v11, %v316_v11   ;;  %v724_v10 = vphi %v812_v10, %v330_v10   ;;  %v720_v9 = vphi %v810_v9, %v338_v9   ;;  %v716_v8 = vphi %v808_v8, %v352_v8  }
   0x5   : > { %599 = vmatprep.subr.bf16.mxu0 %v734_v14  ;;  %605 = vmatprep.subr.bf16.mxu1 %v734_v14  ;;  %v609_v16 = vpack.c.bf16 %v806_v7, %v801_v6  ;;  %vm735_vm0 = vmmov 0   ;;  %v736_v17 = vmov 0.0   ;;  %v218_v18 = vlaneseq  ;;  %s566_s6 = sshll.u32 %s35_s5, 2  ;;  %s565_s10 = sshll.u32 %s732_s2, 2 }
   0x6   : > { %601 = vmatpush3.bf16.msra.mxu0 %v600_v12  ;;  %607 = vmatpush3.bf16.msra.mxu1 %v606_v13  ;;  %v737_v19 = vmov 1983009808   ;;  %vm48_vm1 = vcmask 261120   ;;  %s42_s9 = scalar_lea.vmem %s998_s0, %s566_s6  ;;  %s38_s13 = scalar_lea.vmem %s998_s0, %s565_s10  ;;  %v740_v49 = vmov 0   ;;  %vm288_vm2 = vcmask 254976  }
   0x7   : > { %602 = vmatprep.subr.bf16.mxu0 %v734_v14  ;;  %585 = vmatprep.mubr.msk.f32.mxu0 %vm735_vm0, %v736_v17  ;;  %v216_v20 = vunpack.c.l.s4 %v737_v19  ;;  %v219_v21 = vshrl.u32 %v218_v18, 7  ;;  %v43_v26 = vld [vmem:[%s42_s9] sm:$0xf]  ;;  %s739_s14 = smov 64   ;;  %s557_s15 = sshll.u32 %s732_s2, 1 }
   0x8   : > { %608 = vmatprep.subr.bf16.mxu1 %v734_v14  ;;  %596 = vmatprep.mubr.msk.f32.mxu1 %vm735_vm0, %v736_v17  ;;  %v197_v27 = vrot.slane %v43_v26, 2  ;;  %v39_v28 = vld [vmem:[%s38_s13] sm:$0xf]  ;;  %s870_s16 = sshll.u32 %s35_s5, 1  ;;  %s44_s19 = scalar_lea.vmem %s999_s1, %s557_s15 }
   0x9   : > { %v217_v22 = vunpack.c.0.s8 %v216_v20  ;;  %661 = vset.pattern.permute.xlu1 %v740_v49  ;;  %660 = vset.pattern.permute.xlu0 %v740_v49  ;;  %s46_s22 = scalar_lea.vmem %s999_s1, %s870_s16  ;;  %v45_v59 = vld [vmem:[%s44_s19] sm:$0x3]  ;;  %s741_s23 = smov 96  }
   0xa   : > { %604 = vmatpush3.bf16.msra.mxu0 %v603_v15  ;;  %610 = vmatpush3.bf16.msra.mxu1 %v609_v16  ;;  %v47_v61 = vld [vmem:[%s46_s22] sm:$0x3]  ;;  %v309_v63 = vsub.f32 1.0, %v45_v59  ;;  %s287_s24 = scalar_lea.vmem [#allocation2], %s557_s15  ;;  %s307_s25 = scalar_lea.vmem [#allocation3], %s870_s16 }
   0xb   : > { %v841_v23 = vsub.s32 %v217_v22, %v219_v21  ;;  %v331_v62 = vsub.f32 1.0, %v47_v61  ;;  %s30_s2 = sadd.s32 1, %s732_s2  }
   0xc   : > { %p27_p0 = scmp.ge.s32.totalorder %s30_s2, 8  }
   0xd   : > { %586 = vmatmul.mubr.msk.f32.vlgmr.msra.gmra.mrb[0].mxu0 %vm48_vm1, %v728_v11  ;;  %597 = vmatmul.mubr.msk.f32.vlgmr.msra.gmra.mrb[0].mxu1 %vm48_vm1, %v720_v9  ;;  %v221_v24 = vrot.slane %v724_v10, %v841_v23  ;;  %v249_v25 = vrot.slane %v716_v8, %v841_v23  ;;  %s742_s26 = smov (%p27_p0), 32   ;;  %vm410_vm3 = vcmask (%p27_p0), 517120  }
   0xf   : > { %222 = vrot.lane.b32.xlu1 %v221_v24, %s738_s3 }
  0x13   : > { %250 = vrot.lane.b32.xlu1 %v249_v25, %s738_s3 }
  0x81   : > { %v223_v50 = vpop.permute.xlu1 %222 }
  0x85   : > { %v251_v52 = vpop.permute.xlu1 %250 }
  0xe0   : > { %v118_v29 = vpop.f32.mrb[0].mxu0  ;;  %v192_v30 = vpop.f32.mrb[0].mxu1 }
  0xe1   : > { %v122_v31 = vadd.f32 %v118_v29, %v39_v28  ;;  %v587_v32 = vpop.f32.mrb[1].mxu0  ;;  %v199_v33 = vadd.f32 %v197_v27, %v192_v30  ;;  %v598_v34 = vpop.f32.mrb[1].mxu1 }
  0xe3   : > { %662 = vtanh.f32 %v122_v31  ;;  %v563_v37 = vmul.f32 -1.442695, %v122_v31  ;;  %v564_v38 = vmul.f32 -1.442695, %v199_v33 }
  0xe4   : > { %664 = vtanh.f32 %v199_v33 }
  0xe5   : > { %666 = vpow2.f32 %v563_v37 }
  0xe6   : > { %668 = vpow2.f32 %v564_v38 }
  0xed   : > { %v663_v35 = vpop.eup %662 }
  0xee   : > { %227 = vrot.lane.b32.xlu0 %v663_v35, %s739_s14  ;;  %v665_v36 = vpop.eup %664 }
  0xef   : > { %v667_v39 = vpop.eup %666 }
  0xf0   : > { %v203_v40 = vadd.f32 1.0, %v667_v39  ;;  %v669_v41 = vpop.eup %668 }
  0xf1   : > { %v210_v42 = vadd.f32 1.0, %v669_v41 }
  0xf2   : > { %255 = vrot.lane.b32.xlu0 %v665_v36, %s739_s14  ;;  %670 = vrcp.f32 %v203_v40 }
  0xf3   : > { %672 = vrcp.f32 %v210_v42 }
  0xfc   : > { %v671_v43 = vpop.eup %670 }
  0xfd   : > { %v673_v46 = vpop.eup %672  ;;  %v225_v51 = vmul.f32 %v671_v43, %v223_v50 }
  0xfe   : > { %v253_v55 = vmul.f32 %v673_v46, %v251_v52 }
 0x160   : > { %v228_v44 = vpop.permute.xlu0 %227 }
 0x161   : > { %v230_v45 = vmul.f32 %v671_v43, %v228_v44 }
 0x163   : > { %232 = vrot.lane.b32.xlu0 %v230_v45, %s738_s3 }
 0x164   : > { %v256_v47 = vpop.permute.xlu0 %255 }
 0x165   : > { %v258_v48 = vmul.f32 %v673_v46, %v256_v47 }
 0x167   : > { %260 = vrot.lane.b32.xlu1 %v258_v48, %s738_s3 }
 0x1d5   : > { %v233_v53 = vpop.permute.xlu0 %232 }
 0x1d6   : > { %v235_v54 = vadd.f32 %v233_v53, %v225_v51 }
 0x1d8   : > { %674 = vtanh.f32 %v235_v54  ;;  %v324_v17 = vrot.slane %v235_v54, %v841_v23 }
 0x1d9   : > { %v261_v56 = vpop.permute.xlu1 %260 }
 0x1da   : > { %v263_v57 = vadd.f32 %v261_v56, %v253_v55 }
 0x1dc   : > { %676 = vtanh.f32 %v263_v57  ;;  %v346_v19 = vrot.slane %v263_v57, %v841_v23 }
 0x1e2   : > { %v675_v58 = vpop.eup %674 }
 0x1e3   : > { %238 = vrot.lane.b32.xlu0 %v675_v58, %s739_s14 }
 0x1e6   : > { %v677_v60 = vpop.eup %676 }
 0x1e7   : > { %266 = vrot.lane.b32.xlu1 %v677_v60, %s739_s14  ;;  %272 = vperm.xlu0 %660, %v45_v59  }
 0x1eb   : > { %292 = vperm.xlu1 %661, %v47_v61   ;;  %334 = vperm.xlu0 %660, %v331_v62  }
 0x1ef   : > { %312 = vperm.xlu1 %661, %v309_v63  }
 0x255   : > { %v239_v12 = vpop.permute.xlu0 %238 }
 0x256   : > { %v241_v13 = vmul.f32 %v671_v43, %v239_v12 }
 0x258   : > { %v282_v14 = vrot.slane %v241_v13, %v841_v23 }
 0x259   : > { %v267_v15 = vpop.permute.xlu1 %266 }
 0x25a   : > { %v269_v16 = vmul.f32 %v673_v46, %v267_v15  ;;  %283 = vrot.lane.b32.xlu1 %v282_v14, %s738_s3 }
 0x25c   : > { %v302_v18 = vrot.slane %v269_v16, %v841_v23 }
 0x25e   : > { %325 = vrot.lane.b32.xlu1 %v324_v17, %s741_s23  ;;  %303 = vrot.lane.b32.xlu0 %v302_v18, %s738_s3 }
 0x262   : > { %347 = vrot.lane.b32.xlu0 %v346_v19, %s741_s23 }
 0x266   : > { %v273_v21 = vpop.permute.xlu0 %272 }
 0x26a   : > { %v293_v20 = vpop.permute.xlu1 %292  ;;  %v335_v24 = vpop.permute.xlu0 %334 }
 0x26b   : > { %v337_v30 = vmul.f32 %v720_v9, %v335_v24  ;;  %v351_v34 = vmul.f32 %v716_v8, %v335_v24 }
 0x26e   : > { %v313_v22 = vpop.permute.xlu1 %312 }
 0x26f   : > { %v315_v26 = vmul.f32 %v728_v11, %v313_v22  ;;  %v329_v23 = vmul.f32 %v724_v10, %v313_v22 }
 0x2cc   : > { %v284_v25 = vpop.permute.xlu1 %283 }
 0x2cd   : > { %v286_v27 = vmul.f32 %v284_v25, %v273_v21 }
 0x2cf   : > { %289 = vst.msk [vmem:[%s287_s24] sm:$0x3] %vm288_vm2, %v286_v27  ;;  %v316_v11 = vadd.f32 %v315_v26, %v286_v27  }
 0x2d0   : > { %v304_v28 = vpop.permute.xlu0 %303  ;;  %v326_v29 = vpop.permute.xlu1 %325 }
 0x2d1   : > { %v306_v31 = vmul.f32 %v304_v28, %v293_v20  ;;  %v328_v32 = vmul.f32 %v326_v29, %v273_v21  ;;  %29 = sbr.rel (!%p27_p0) target bundleno = 4 (0x4), region = 49 }
 0x2d3   : > { %308 = vst.msk [vmem:[%s307_s25] sm:$0x3] %vm288_vm2, %v306_v31  ;;  %v338_v9 = vadd.f32 %v337_v30, %v306_v31   ;;  %v330_v10 = vadd.f32 %v329_v23, %v328_v32  }
 0x2d4   : > { %v348_v33 = vpop.permute.xlu0 %347 }
 0x2d5   : > { %v350_v35 = vmul.f32 %v348_v33, %v293_v20 }
 0x2d6   :  { %v353_v11 = vld [vmem:[#allocation2] sm:$0x3] (%p27_p0)  ;;  %v355_v44 = vld [vmem:[#allocation2 + $0x4] sm:$0x3] (%p27_p0)  ;;  %v354_v5 = vld [vmem:[#allocation2 + $0x2] sm:$0x3] (%p27_p0) }
 0x2d7   : > { %v352_v8 = vadd.f32 %v351_v34, %v350_v35   ;;  %v356_v6 = vld [vmem:[#allocation2 + $0x6] sm:$0x3] (%p27_p0)  ;;  %v357_v47 = vld [vmem:[#allocation2 + $0x8] sm:$0x3] (%p27_p0)  ;;  %v358_v48 = vld [vmem:[#allocation2 + $0xa] sm:$0x3] (%p27_p0) }
 0x2d8   :  { %v359_v55 = vld [vmem:[#allocation2 + $0xc] sm:$0x3]  ;;  %v360_v56 = vld [vmem:[#allocation2 + $0xe] sm:$0x3] }
 0x2da   :  { %v361_v36 = vld [vmem:[#allocation3] sm:$0x3]  ;;  %v363_v37 = vld [vmem:[#allocation3 + $0x4] sm:$0x3]  ;;  %v362_v38 = vld [vmem:[#allocation3 + $0x2] sm:$0x3] }
 0x2db   :  { %377 = vrot.lane.b32.xlu0 %v361_v36, %s742_s26  ;;  %381 = vrot.lane.b32.xlu1 %v363_v37, %s742_s26  ;;  %v364_v39 = vld [vmem:[#allocation3 + $0x6] sm:$0x3]  ;;  %v365_v40 = vld [vmem:[#allocation3 + $0x8] sm:$0x3]  ;;  %v366_v41 = vld [vmem:[#allocation3 + $0xa] sm:$0x3] }
 0x2dc   :  { %v367_v42 = vld [vmem:[#allocation3 + $0xc] sm:$0x3]  ;;  %v368_v43 = vld [vmem:[#allocation3 + $0xe] sm:$0x3] }
 0x2df   :  { %379 = vrot.lane.b32.xlu0 %v362_v38, %s742_s26  ;;  %383 = vrot.lane.b32.xlu1 %v364_v39, %s742_s26 }
 0x2e3   :  { %385 = vrot.lane.b32.xlu0 %v365_v40, %s742_s26  ;;  %387 = vrot.lane.b32.xlu1 %v366_v41, %s742_s26 }
 0x2e7   :  { %389 = vrot.lane.b32.xlu0 %v367_v42, %s742_s26  ;;  %391 = vrot.lane.b32.xlu1 %v368_v43, %s742_s26 }
 0x34d   :  { %v378_v0 = vpop.permute.xlu0 %377  ;;  %v382_v1 = vpop.permute.xlu1 %381 }
 0x34e   :  { %v402_v2 = vsel %vm48_vm1, %v353_v11, %v378_v0  ;;  %v404_v3 = vsel %vm48_vm1, %v355_v44, %v382_v1 }
 0x34f   :  { %v411_v4 = vsel %vm410_vm3, %v402_v2, 0.0  ;;  %v417_v8 = vsel %vm410_vm3, %v404_v3, 0.0 }
 0x350   :  { %412 = vadd.xlane.f32.xlu0 %v411_v4 }
 0x351   :  { %v380_v7 = vpop.permute.xlu0 %379  ;;  %v384_v9 = vpop.permute.xlu1 %383 }
 0x352   :  { %v403_v10 = vsel %vm48_vm1, %v354_v5, %v380_v7  ;;  %v405_v45 = vsel %vm48_vm1, %v356_v6, %v384_v9 }
 0x353   :  { %v414_v46 = vsel %vm410_vm3, %v403_v10, 0.0  ;;  %v420_v50 = vsel %vm410_vm3, %v405_v45, 0.0 }
 0x354   :  { %415 = vadd.xlane.f32.xlu1 %v414_v46  ;;  %418 = vadd.xlane.f32.xlu0 %v417_v8 }
 0x355   :  { %v386_v49 = vpop.permute.xlu0 %385  ;;  %v388_v51 = vpop.permute.xlu1 %387 }
 0x356   :  { %v406_v52 = vsel %vm48_vm1, %v357_v47, %v386_v49  ;;  %v407_v53 = vsel %vm48_vm1, %v358_v48, %v388_v51 }
 0x357   :  { %v423_v54 = vsel %vm410_vm3, %v406_v52, 0.0  ;;  %v426_v58 = vsel %vm410_vm3, %v407_v53, 0.0 }
 0x358   :  { %424 = vadd.xlane.f32.xlu1 %v423_v54  ;;  %421 = vadd.xlane.f32.xlu0 %v420_v50 }
 0x359   :  { %v390_v57 = vpop.permute.xlu0 %389  ;;  %v392_v59 = vpop.permute.xlu1 %391 }
 0x35a   :  { %v408_v60 = vsel %vm48_vm1, %v359_v55, %v390_v57  ;;  %v409_v61 = vsel %vm48_vm1, %v360_v56, %v392_v59 }
 0x35b   :  { %v429_v62 = vsel %vm410_vm3, %v408_v60, 0.0  ;;  %v432_v63 = vsel %vm410_vm3, %v409_v61, 0.0 }
 0x35c   :  { %430 = vadd.xlane.f32.xlu1 %v429_v62  ;;  %427 = vadd.xlane.f32.xlu0 %v426_v58 }
 0x360   :  { %433 = vadd.xlane.f32.xlu0 %v432_v63 }
 0x3dd   :  { %v413_v12 = vpop.xlane.xlu0 %412 }
 0x3de   :  { %v436_v13 = vmul.f32 0.015625, %v413_v12 }
 0x3e0   :  { %v923_v14 = vsub.f32 %v402_v2, %v436_v13 }
 0x3e1   :  { %v416_v15 = vpop.xlane.xlu1 %415  ;;  %v419_v16 = vpop.xlane.xlu0 %418 }
 0x3e2   :  { %v437_v17 = vmul.f32 0.015625, %v416_v15  ;;  %v438_v18 = vmul.f32 0.015625, %v419_v16  ;;  %v452_v19 = vmul.f32 %v923_v14, %v923_v14 }
 0x3e4   :  { %v927_v20 = vsub.f32 %v403_v10, %v437_v17  ;;  %v929_v21 = vsub.f32 %v404_v3, %v438_v18  ;;  %v460_v22 = vsel %vm410_vm3, %v452_v19, 0.0 }
 0x3e5   :  { %v425_v24 = vpop.xlane.xlu1 %424  ;;  %461 = vadd.xlane.f32.xlu1 %v460_v22  ;;  %v422_v25 = vpop.xlane.xlu0 %421 }
 0x3e6   :  { %v440_v26 = vmul.f32 0.015625, %v425_v24  ;;  %v439_v27 = vmul.f32 0.015625, %v422_v25  ;;  %v453_v28 = vmul.f32 %v927_v20, %v927_v20  ;;  %v454_v29 = vmul.f32 %v929_v21, %v929_v21 }
 0x3e8   :  { %v936_v30 = vsub.f32 %v406_v52, %v440_v26  ;;  %v938_v23 = vsub.f32 %v405_v45, %v439_v27  ;;  %v463_v31 = vsel %vm410_vm3, %v453_v28, 0.0  ;;  %v466_v32 = vsel %vm410_vm3, %v454_v29, 0.0 }
 0x3e9   :  { %v431_v33 = vpop.xlane.xlu1 %430  ;;  %464 = vadd.xlane.f32.xlu0 %v463_v31  ;;  %467 = vadd.xlane.f32.xlu1 %v466_v32  ;;  %v428_v34 = vpop.xlane.xlu0 %427 }
 0x3ea   :  { %v442_v35 = vmul.f32 0.015625, %v431_v33  ;;  %v441_v36 = vmul.f32 0.015625, %v428_v34  ;;  %v456_v37 = vmul.f32 %v936_v30, %v936_v30  ;;  %v455_v38 = vmul.f32 %v938_v23, %v938_v23 }
 0x3ec   :  { %v946_v39 = vsub.f32 %v408_v60, %v442_v35  ;;  %v948_v40 = vsub.f32 %v407_v53, %v441_v36  ;;  %v472_v41 = vsel %vm410_vm3, %v456_v37, 0.0  ;;  %v469_v42 = vsel %vm410_vm3, %v455_v38, 0.0 }
 0x3ed   :  { %473 = vadd.xlane.f32.xlu1 %v472_v41  ;;  %470 = vadd.xlane.f32.xlu0 %v469_v42  ;;  %v434_v43 = vpop.xlane.xlu0 %433 }
 0x3ee   :  { %v443_v11 = vmul.f32 0.015625, %v434_v43  ;;  %v458_v44 = vmul.f32 %v946_v39, %v946_v39  ;;  %v457_v0 = vmul.f32 %v948_v40, %v948_v40 }
 0x3f0   :  { %v451_v1 = vsub.f32 %v409_v61, %v443_v11  ;;  %v478_v2 = vsel %vm410_vm3, %v458_v44, 0.0  ;;  %v475_v3 = vsel %vm410_vm3, %v457_v0, 0.0 }
 0x3f1   :  { %479 = vadd.xlane.f32.xlu1 %v478_v2  ;;  %476 = vadd.xlane.f32.xlu0 %v475_v3 }
 0x3f2   :  { %v459_v4 = vmul.f32 %v451_v1, %v451_v1 }
 0x3f4   :  { %v481_v5 = vsel %vm410_vm3, %v459_v4, 0.0 }
 0x3f5   :  { %482 = vadd.xlane.f32.xlu0 %v481_v5 }
 0x472   :  { %v462_v6 = vpop.xlane.xlu1 %461 }
 0x473   :  { %v484_v7 = vmul.f32 0.015625, %v462_v6 }
 0x475   :  { %v492_v8 = vadd.f32 1e-05, %v484_v7 }
 0x476   :  { %v468_v9 = vpop.xlane.xlu1 %467  ;;  %v465_v10 = vpop.xlane.xlu0 %464 }
 0x477   :  { %678 = vrsqrt.f32 %v492_v8  ;;  %v486_v45 = vmul.f32 0.015625, %v468_v9  ;;  %v485_v46 = vmul.f32 0.015625, %v465_v10 }
 0x479   :  { %v494_v47 = vadd.f32 1e-05, %v486_v45  ;;  %v493_v48 = vadd.f32 1e-05, %v485_v46 }
 0x47a   :  { %v474_v49 = vpop.xlane.xlu1 %473  ;;  %v471_v50 = vpop.xlane.xlu0 %470 }
 0x47b   :  { %680 = vrsqrt.f32 %v494_v47  ;;  %v488_v51 = vmul.f32 0.015625, %v474_v49  ;;  %v487_v52 = vmul.f32 0.015625, %v471_v50 }
 0x47c   :  { %682 = vrsqrt.f32 %v493_v48 }
 0x47d   :  { %v496_v53 = vadd.f32 1e-05, %v488_v51  ;;  %v495_v54 = vadd.f32 1e-05, %v487_v52 }
 0x47e   :  { %v480_v55 = vpop.xlane.xlu1 %479  ;;  %v477_v56 = vpop.xlane.xlu0 %476 }
 0x47f   :  { %684 = vrsqrt.f32 %v496_v53  ;;  %v490_v57 = vmul.f32 0.015625, %v480_v55  ;;  %v489_v58 = vmul.f32 0.015625, %v477_v56 }
 0x480   :  { %686 = vrsqrt.f32 %v495_v54 }
 0x481   :  { %v679_v59 = vpop.eup %678  ;;  %v498_v60 = vadd.f32 1e-05, %v490_v57  ;;  %v497_v61 = vadd.f32 1e-05, %v489_v58 }
 0x482   :  { %v508_v62 = vmul.f32 %v679_v59, %v923_v14  ;;  %v483_v63 = vpop.xlane.xlu0 %482 }
 0x483   :  { %688 = vrsqrt.f32 %v498_v60  ;;  %v491_v12 = vmul.f32 0.015625, %v483_v63 }
 0x484   :  { %516 = vst.msk [vmem:[%s1002_s4] sm:$0x3] %vm410_vm3, %v508_v62  ;;  %690 = vrsqrt.f32 %v497_v61 }
 0x485   :  { %v681_v13 = vpop.eup %680  ;;  %v499_v15 = vadd.f32 1e-05, %v491_v12 }
 0x486   :  { %v683_v16 = vpop.eup %682  ;;  %v510_v17 = vmul.f32 %v681_v13, %v929_v21 }
 0x487   :  { %v509_v18 = vmul.f32 %v683_v16, %v927_v20  ;;  %692 = vrsqrt.f32 %v499_v15 }
 0x488   :  { %518 = vst.msk [vmem:[%s1002_s4 + $0x4] sm:$0x3] %vm410_vm3, %v510_v17 }
 0x489   :  { %v685_v14 = vpop.eup %684  ;;  %517 = vst.msk [vmem:[%s1002_s4 + $0x2] sm:$0x3] %vm410_vm3, %v509_v18 }
 0x48a   :  { %v687_v19 = vpop.eup %686  ;;  %v512_v22 = vmul.f32 %v685_v14, %v936_v30 }
 0x48b   :  { %v511_v24 = vmul.f32 %v687_v19, %v938_v23 }
 0x48c   :  { %520 = vst.msk [vmem:[%s1002_s4 + $0x8] sm:$0x3] %vm410_vm3, %v512_v22 }
 0x48d   :  { %v689_v20 = vpop.eup %688  ;;  %519 = vst.msk [vmem:[%s1002_s4 + $0x6] sm:$0x3] %vm410_vm3, %v511_v24 }
 0x48e   :  { %v691_v21 = vpop.eup %690  ;;  %v514_v25 = vmul.f32 %v689_v20, %v946_v39 }
 0x48f   :  { %v513_v26 = vmul.f32 %v691_v21, %v948_v40 }
 0x490   :  { %522 = vst.msk [vmem:[%s1002_s4 + $0xc] sm:$0x3] %vm410_vm3, %v514_v25 }
 0x491   :  { %v693_v27 = vpop.eup %692  ;;  %521 = vst.msk [vmem:[%s1002_s4 + $0xa] sm:$0x3] %vm410_vm3, %v513_v26 }
 0x492   :  { %v515_v28 = vmul.f32 %v693_v27, %v451_v1 }
 0x494   :  { %523 = vst.msk [vmem:[%s1002_s4 + $0xe] sm:$0x3] %vm410_vm3, %v515_v28 }

// kernel: text_encoder_forward.12
= control target key start
LH: loop header
LB: loop body
LE: loop exit
PB: predicated region body
PF: predicated region fallthrough
CT: control target
= control target key end

     0   :  { %v900_v8 = vmov 0.0   ;;  %v902_v9 = vmov 0.0   ;;  %v904_v10 = vmov 0.0   ;;  %v906_v11 = vmov 0.0   ;;  %s1138_s0 = inlined_call_operand.vmem [shape: f32[8,2,256], index: 0, kind: input, shape index: {}]   ;;  %s1139_s1 = inlined_call_operand.vmem [shape: f32[8,2,1], index: 1, kind: input, shape index: {}]   ;;  %s1140_s2 = inlined_call_operand.vmem [shape: f32[32,128], index: 2, kind: input, shape index: {}]   ;;  %s1141_s3 = inlined_call_operand.vmem [shape: f32[32,128], index: 3, kind: input, shape index: {}]   ;;  %s1142_s4 = inlined_call_operand.vmem [shape: f32[8,2,64], index: 4, kind: input, shape index: {}]   ;;  %s1143_s5 = inlined_call_operand.vmem [shape: f32[8,2,64], index: 5, kind: output, shape index: {}]  }
   0x1   :  { %v863_v0 = vld [vmem:[%s1140_s2] sm:$0xff]  ;;  %v868_v1 = vld [vmem:[%s1140_s2 + $0x8] sm:$0xff]  ;;  %v873_v2 = vld [vmem:[%s1140_s2 + $0x10] sm:$0xff] }
   0x2   :  { %v878_v3 = vld [vmem:[%s1140_s2 + $0x18] sm:$0xff]  ;;  %v883_v4 = vld [vmem:[%s1141_s3] sm:$0xff]  ;;  %v888_v5 = vld [vmem:[%s1141_s3 + $0x8] sm:$0xff]  ;;  %s908_s2 = smov 0  }
   0x3   :  { %v893_v6 = vld [vmem:[%s1141_s3 + $0x10] sm:$0xff]  ;;  %v898_v7 = vld [vmem:[%s1141_s3 + $0x18] sm:$0xff] }
   0x4 LB: > { %v683_v12 = vpack.c.bf16 %v868_v1, %v863_v0  ;;  %v689_v13 = vpack.c.bf16 %v888_v5, %v883_v4  ;;  %v820_v14 = vmov 0.0|0.0   ;;  %v686_v15 = vpack.c.bf16 %v878_v3, %v873_v2  ;;  %s824_s3 = smov 32   ;;  %s38_s9 = ssub.s32 7, %s818_s2  ;;  %s818_s2 = sphi %s908_s2, %s33_s2   ;;  %v814_v11 = vphi %v906_v11, %v319_v11   ;;  %v810_v10 = vphi %v904_v10, %v333_v10   ;;  %v806_v9 = vphi %v902_v9, %v341_v9   ;;  %v802_v8 = vphi %v900_v8, %v355_v8  }
   0x5   : > { %682 = vmatprep.subr.bf16.mxu0 %v820_v14  ;;  %688 = vmatprep.subr.bf16.mxu1 %v820_v14  ;;  %v692_v16 = vpack.c.bf16 %v898_v7, %v893_v6  ;;  %vm821_vm0 = vmmov 0   ;;  %v822_v17 = vmov 0.0   ;;  %v221_v18 = vlaneseq  ;;  %s649_s10 = sshll.u32 %s38_s9, 2  ;;  %s648_s14 = sshll.u32 %s818_s2, 2 }
   0x6   : > { %684 = vmatpush3.bf16.msra.mxu0 %v683_v12  ;;  %690 = vmatpush3.bf16.msra.mxu1 %v689_v13  ;;  %v823_v19 = vmov 1983009808   ;;  %vm51_vm1 = vcmask 261120   ;;  %s45_s13 = scalar_lea.vmem %s1138_s0, %s649_s10  ;;  %s41_s17 = scalar_lea.vmem %s1138_s0, %s648_s14  ;;  %v826_v49 = vmov 0   ;;  %vm291_vm2 = vcmask 254976  }
   0x7   : > { %685 = vmatprep.subr.bf16.mxu0 %v820_v14  ;;  %668 = vmatprep.mubr.msk.f32.mxu0 %vm821_vm0, %v822_v17  ;;  %v219_v20 = vunpack.c.l.s4 %v823_v19  ;;  %v222_v21 = vshrl.u32 %v221_v18, 7  ;;  %v46_v26 = vld [vmem:[%s45_s13] sm:$0xf]  ;;  %s825_s18 = smov 64   ;;  %s640_s19 = sshll.u32 %s818_s2, 1 }
   0x8   : > { %691 = vmatprep.subr.bf16.mxu1 %v820_v14  ;;  %679 = vmatprep.mubr.msk.f32.mxu1 %vm821_vm0, %v822_v17  ;;  %v200_v27 = vrot.slane %v46_v26, 2  ;;  %v42_v28 = vld [vmem:[%s41_s17] sm:$0xf]  ;;  %s962_s20 = sshll.u32 %s38_s9, 1  ;;  %s47_s23 = scalar_lea.vmem %s1139_s1, %s640_s19 }
   0x9   : > { %v220_v22 = vunpack.c.0.s8 %v219_v20  ;;  %745 = vset.pattern.permute.xlu1 %v826_v49  ;;  %744 = vset.pattern.permute.xlu0 %v826_v49  ;;  %s49_s26 = scalar_lea.vmem %s1139_s1, %s962_s20  ;;  %v48_v59 = vld [vmem:[%s47_s23] sm:$0x3]  ;;  %s827_s27 = smov 96  }
   0xa   : > { %687 = vmatpush3.bf16.msra.mxu0 %v686_v15  ;;  %693 = vmatpush3.bf16.msra.mxu1 %v692_v16  ;;  %v50_v61 = vld [vmem:[%s49_s26] sm:$0x3]  ;;  %v312_v63 = vsub.f32 1.0, %v48_v59  ;;  %s290_s28 = scalar_lea.vmem [#allocation2], %s640_s19  ;;  %s310_s29 = scalar_lea.vmem [#allocation3], %s962_s20 }
   0xb   : > { %v933_v23 = vsub.s32 %v220_v22, %v222_v21  ;;  %v334_v62 = vsub.f32 1.0, %v50_v61  ;;  %s33_s2 = sadd.s32 1, %s818_s2  }
   0xc   : > { %p30_p0 = scmp.ge.s32.totalorder %s33_s2, 8  }
   0xd   : > { %669 = vmatmul.mubr.msk.f32.vlgmr.msra.gmra.mrb[0].mxu0 %vm51_vm1, %v814_v11  ;;  %680 = vmatmul.mubr.msk.f32.vlgmr.msra.gmra.mrb[0].mxu1 %vm51_vm1, %v806_v9  ;;  %v224_v24 = vrot.slane %v810_v10, %v933_v23  ;;  %v252_v25 = vrot.slane %v802_v8, %v933_v23  ;;  %v414_v0 = vld [vmem:[%s1139_s1 + $0x2] sm:$0x3] (%p30_p0)  ;;  %v418_v1 = vld [vmem:[%s1139_s1 + $0xa] sm:$0x3] (%p30_p0)  ;;  %v417_v2 = vld [vmem:[%s1139_s1 + $0x8] sm:$0x3] (%p30_p0) }
   0xe   :  { %v420_v3 = vld [vmem:[%s1139_s1 + $0xe] sm:$0x3] (%p30_p0)  ;;  %v419_v4 = vld [vmem:[%s1139_s1 + $0xc] sm:$0x3] (%p30_p0)  ;;  %v421_v49 = vld [vmem:[%s1142_s4] sm:$0x3] (%p30_p0) }
   0xf   : > { %225 = vrot.lane.b32.xlu1 %v224_v24, %s824_s3  ;;  %vm493_vm3 = vcmask (%p30_p0), 517120  }
  0x13   : > { %253 = vrot.lane.b32.xlu1 %v252_v25, %s824_s3 }
  0x81   : > { %v226_v50 = vpop.permute.xlu1 %225 }
  0x85   : > { %v254_v52 = vpop.permute.xlu1 %253 }
  0xe0   : > { %v121_v29 = vpop.f32.mrb[0].mxu0  ;;  %v195_v30 = vpop.f32.mrb[0].mxu1 }
  0xe1   : > { %v125_v31 = vadd.f32 %v121_v29, %v42_v28  ;;  %v670_v32 = vpop.f32.mrb[1].mxu0  ;;  %v202_v33 = vadd.f32 %v200_v27, %v195_v30  ;;  %v681_v34 = vpop.f32.mrb[1].mxu1 }
  0xe3   : > { %746 = vtanh.f32 %v125_v31  ;;  %v646_v37 = vmul.f32 -1.442695, %v125_v31  ;;  %v647_v38 = vmul.f32 -1.442695, %v202_v33 }
  0xe4   : > { %748 = vtanh.f32 %v202_v33 }
  0xe5   : > { %750 = vpow2.f32 %v646_v37  ;;  %v413_v37 = vld [vmem:[%s1139_s1] sm:$0x3] (%p30_p0) }
  0xe6   : > { %752 = vpow2.f32 %v647_v38  ;;  %v828_v38 = vmov (%p30_p0), 0  }
  0xed   : > { %v747_v35 = vpop.eup %746 }
  0xee   : > { %230 = vrot.lane.b32.xlu0 %v747_v35, %s825_s18  ;;  %v749_v36 = vpop.eup %748 }
  0xef   : > { %v751_v39 = vpop.eup %750 }
  0xf0   : > { %v206_v40 = vadd.f32 1.0, %v751_v39  ;;  %v753_v41 = vpop.eup %752 }
  0xf1   : > { %v213_v42 = vadd.f32 1.0, %v753_v41 }
  0xf2   : > { %258 = vrot.lane.b32.xlu0 %v749_v36, %s825_s18  ;;  %754 = vrcp.f32 %v206_v40  ;;  %v415_v36 = vld [vmem:[%s1139_s1 + $0x4] sm:$0x3] (%p30_p0) }
  0xf3   : > { %756 = vrcp.f32 %v213_v42 }
  0xfc   : > { %v755_v43 = vpop.eup %754 }
  0xfd   : > { %v757_v46 = vpop.eup %756  ;;  %v228_v51 = vmul.f32 %v755_v43, %v226_v50  ;;  %v422_v50 = vld [vmem:[%s1142_s4 + $0x2] sm:$0x3] (%p30_p0) }
  0xfe   : > { %v256_v55 = vmul.f32 %v757_v46, %v254_v52 }
 0x160   : > { %v231_v44 = vpop.permute.xlu0 %230 }
 0x161   : > { %v233_v45 = vmul.f32 %v755_v43, %v231_v44 }
 0x163   : > { %235 = vrot.lane.b32.xlu0 %v233_v45, %s824_s3 }
 0x164   : > { %v259_v47 = vpop.permute.xlu0 %258 }
 0x165   : > { %v261_v48 = vmul.f32 %v757_v46, %v259_v47 }
 0x167   : > { %263 = vrot.lane.b32.xlu1 %v261_v48, %s824_s3 }
 0x1d5   : > { %v236_v53 = vpop.permute.xlu0 %235 }
 0x1d6   : > { %v238_v54 = vadd.f32 %v236_v53, %v228_v51 }
 0x1d8   : > { %758 = vtanh.f32 %v238_v54  ;;  %v327_v17 = vrot.slane %v238_v54, %v933_v23 }
 0x1d9   : > { %v264_v56 = vpop.permute.xlu1 %263 }
 0x1da   : > { %v266_v57 = vadd.f32 %v264_v56, %v256_v55 }
 0x1dc   : > { %760 = vtanh.f32 %v266_v57  ;;  %v349_v19 = vrot.slane %v266_v57, %v933_v23  ;;  %v423_v57 = vld [vmem:[%s1142_s4 + $0x4] sm:$0x3] (%p30_p0) }
 0x1e2   : > { %v759_v58 = vpop.eup %758 }
 0x1e3   : > { %241 = vrot.lane.b32.xlu0 %v759_v58, %s825_s18  ;;  %v424_v58 = vld [vmem:[%s1142_s4 + $0x6] sm:$0x3] (%p30_p0) }
 0x1e6   : > { %v761_v60 = vpop.eup %760 }
 0x1e7   : > { %269 = vrot.lane.b32.xlu1 %v761_v60, %s825_s18  ;;  %275 = vperm.xlu0 %744, %v48_v59   ;;  %s829_s18 = smov (%p30_p0), 32  }
 0x1eb   : > { %295 = vperm.xlu1 %745, %v50_v61   ;;  %337 = vperm.xlu0 %744, %v334_v62  }
 0x1ef   : > { %315 = vperm.xlu1 %745, %v312_v63   ;;  %762 = vset.pattern.permute.xlu0 (%p30_p0), %v828_v38 }
 0x1f3   :  { %763 = vset.pattern.permute.xlu1 (%p30_p0), %v828_v38 }
 0x255   : > { %v242_v12 = vpop.permute.xlu0 %241 }
 0x256   : > { %v244_v13 = vmul.f32 %v755_v43, %v242_v12 }
 0x258   : > { %v285_v14 = vrot.slane %v244_v13, %v933_v23 }
 0x259   : > { %v270_v15 = vpop.permute.xlu1 %269 }
 0x25a   : > { %v272_v16 = vmul.f32 %v757_v46, %v270_v15  ;;  %286 = vrot.lane.b32.xlu1 %v285_v14, %s824_s3 }
 0x25c   : > { %v305_v18 = vrot.slane %v272_v16, %v933_v23 }
 0x25e   : > { %328 = vrot.lane.b32.xlu1 %v327_v17, %s827_s27  ;;  %306 = vrot.lane.b32.xlu0 %v305_v18, %s824_s3 }
 0x262   : > { %350 = vrot.lane.b32.xlu0 %v349_v19, %s827_s27  ;;  %441 = vperm.xlu1 (%p30_p0), %763, %v415_v36   ;;  %v426_v19 = vld [vmem:[%s1142_s4 + $0xa] sm:$0x3] (%p30_p0) }
 0x266   : > { %v276_v21 = vpop.permute.xlu0 %275  ;;  %431 = vperm.xlu0 (%p30_p0), %762, %v413_v37  }
 0x26a   : > { %v296_v20 = vpop.permute.xlu1 %295  ;;  %v338_v24 = vpop.permute.xlu0 %337  ;;  %436 = vperm.xlu0 (%p30_p0), %762, %v414_v0  }
 0x26b   : > { %v340_v30 = vmul.f32 %v806_v9, %v338_v24  ;;  %v354_v34 = vmul.f32 %v802_v8, %v338_v24 }
 0x26e   : > { %v316_v22 = vpop.permute.xlu1 %315  ;;  %451 = vperm.xlu0 (%p30_p0), %762, %v417_v2  }
 0x26f   : > { %v318_v26 = vmul.f32 %v814_v11, %v316_v22  ;;  %v332_v23 = vmul.f32 %v810_v10, %v316_v22 }
 0x272   :  { %461 = vperm.xlu0 (%p30_p0), %762, %v419_v4  }
 0x2cc   : > { %v287_v25 = vpop.permute.xlu1 %286 }
 0x2cd   : > { %v289_v27 = vmul.f32 %v287_v25, %v276_v21 }
 0x2cf   : > { %292 = vst.msk [vmem:[%s290_s28] sm:$0x3] %vm291_vm2, %v289_v27  ;;  %v319_v11 = vadd.f32 %v318_v26, %v289_v27  }
 0x2d0   : > { %v307_v28 = vpop.permute.xlu0 %306  ;;  %v329_v29 = vpop.permute.xlu1 %328  ;;  %v416_v11 = vld [vmem:[%s1139_s1 + $0x6] sm:$0x3] (%p30_p0) }
 0x2d1   : > { %v309_v31 = vmul.f32 %v307_v28, %v296_v20  ;;  %v331_v32 = vmul.f32 %v329_v29, %v276_v21  ;;  %32 = sbr.rel (!%p30_p0) target bundleno = 4 (0x4), region = 53  ;;  %446 = vperm.xlu1 (%p30_p0), %763, %v416_v11  }
 0x2d3   : > { %311 = vst.msk [vmem:[%s310_s29] sm:$0x3] %vm291_vm2, %v309_v31  ;;  %v341_v9 = vadd.f32 %v340_v30, %v309_v31   ;;  %v333_v10 = vadd.f32 %v332_v23, %v331_v32  }
 0x2d4   : > { %v351_v33 = vpop.permute.xlu0 %350 }
 0x2d5   : > { %v353_v35 = vmul.f32 %v351_v33, %v296_v20  ;;  %456 = vperm.xlu1 (%p30_p0), %763, %v418_v1   ;;  %v425_v20 = vld [vmem:[%s1142_s4 + $0x8] sm:$0x3] (%p30_p0) }
 0x2d6   :  { %v357_v51 = vld [vmem:[#allocation2 + $0x2] sm:$0x3] (%p30_p0)  ;;  %v356_v52 = vld [vmem:[#allocation2] sm:$0x3] (%p30_p0)  ;;  %v359_v63 = vld [vmem:[#allocation2 + $0x6] sm:$0x3] (%p30_p0) }
 0x2d7   : > { %v355_v8 = vadd.f32 %v354_v34, %v353_v35   ;;  %v358_v12 = vld [vmem:[#allocation2 + $0x4] sm:$0x3] (%p30_p0)  ;;  %v361_v28 = vld [vmem:[#allocation2 + $0xa] sm:$0x3] (%p30_p0)  ;;  %v360_v29 = vld [vmem:[#allocation2 + $0x8] sm:$0x3] (%p30_p0) }
 0x2d8   :  { %v428_v34 = vld [vmem:[%s1142_s4 + $0xe] sm:$0x3]  ;;  %v427_v35 = vld [vmem:[%s1142_s4 + $0xc] sm:$0x3] }
 0x2d9   :  { %466 = vperm.xlu1 %763, %v420_v3   ;;  %v363_v2 = vld [vmem:[#allocation2 + $0xe] sm:$0x3]  ;;  %v362_v3 = vld [vmem:[#allocation2 + $0xc] sm:$0x3] }
 0x2da   :  { %v365_v5 = vld [vmem:[#allocation3 + $0x2] sm:$0x3]  ;;  %v364_v6 = vld [vmem:[#allocation3] sm:$0x3]  ;;  %v367_v7 = vld [vmem:[#allocation3 + $0x6] sm:$0x3] }
 0x2db   :  { %380 = vrot.lane.b32.xlu0 %v364_v6, %s829_s18  ;;  %v366_v8 = vld [vmem:[#allocation3 + $0x4] sm:$0x3]  ;;  %v369_v9 = vld [vmem:[#allocation3 + $0xa] sm:$0x3]  ;;  %v368_v10 = vld [vmem:[#allocation3 + $0x8] sm:$0x3] }
 0x2dc   :  { %v371_v39 = vld [vmem:[#allocation3 + $0xe] sm:$0x3]  ;;  %v370_v40 = vld [vmem:[#allocation3 + $0xc] sm:$0x3] }
 0x2dd   :  { %382 = vrot.lane.b32.xlu1 %v365_v5, %s829_s18 }
 0x2df   :  { %384 = vrot.lane.b32.xlu0 %v366_v8, %s829_s18 }
 0x2e1   :  { %386 = vrot.lane.b32.xlu1 %v367_v7, %s829_s18  ;;  %v442_v41 = vpop.permute.xlu1 %441 }
 0x2e2   :  { %v471_v13 = vmul.f32 %v442_v41, %v423_v57 }
 0x2e3   :  { %388 = vrot.lane.b32.xlu0 %v368_v10, %s829_s18 }
 0x2e5   :  { %390 = vrot.lane.b32.xlu1 %v369_v9, %s829_s18  ;;  %v432_v42 = vpop.permute.xlu0 %431 }
 0x2e6   :  { %v469_v53 = vmul.f32 %v432_v42, %v421_v49 }
 0x2e7   :  { %392 = vrot.lane.b32.xlu0 %v370_v40, %s829_s18 }
 0x2e9   :  { %394 = vrot.lane.b32.xlu1 %v371_v39, %s829_s18  ;;  %v437_v44 = vpop.permute.xlu0 %436 }
 0x2ea   :  { %v470_v54 = vmul.f32 %v437_v44, %v422_v50 }
 0x2ed   :  { %v452_v46 = vpop.permute.xlu0 %451 }
 0x2ee   :  { %v473_v23 = vmul.f32 %v452_v46, %v425_v20 }
 0x2f1   :  { %v462_v48 = vpop.permute.xlu0 %461 }
 0x2f2   :  { %v475_v5 = vmul.f32 %v462_v48, %v427_v35 }
 0x34d   :  { %v381_v56 = vpop.permute.xlu0 %380 }
 0x34e   :  { %v405_v60 = vsel %vm51_vm1, %v356_v52, %v381_v56 }
 0x34f   :  { %v477_v62 = vadd.f32 %v469_v53, %v405_v60 }
 0x350   :  { %v447_v43 = vpop.permute.xlu1 %446 }
 0x351   :  { %v472_v14 = vmul.f32 %v447_v43, %v424_v58  ;;  %v485_v16 = vmul.f32 0.70710677, %v477_v62  ;;  %v385_v18 = vpop.permute.xlu0 %384 }
 0x352   :  { %v407_v22 = vsel %vm51_vm1, %v358_v12, %v385_v18 }
 0x353   :  { %v479_v25 = vadd.f32 %v471_v13, %v407_v22  ;;  %v494_v27 = vsel %vm493_vm3, %v485_v16, 0.0 }
 0x354   :  { %v457_v45 = vpop.permute.xlu1 %456  ;;  %495 = vadd.xlane.f32.xlu0 %v494_v27 }
 0x355   :  { %v474_v30 = vmul.f32 %v457_v45, %v426_v19  ;;  %v487_v31 = vmul.f32 0.70710677, %v479_v25  ;;  %v389_v33 = vpop.permute.xlu0 %388 }
 0x356   :  { %v409_v38 = vsel %vm51_vm1, %v360_v29, %v389_v33 }
 0x357   :  { %v481_v0 = vadd.f32 %v473_v23, %v409_v38  ;;  %v500_v1 = vsel %vm493_vm3, %v487_v31, 0.0 }
 0x358   :  { %v467_v47 = vpop.permute.xlu1 %466  ;;  %501 = vadd.xlane.f32.xlu0 %v500_v1 }
 0x359   :  { %v476_v4 = vmul.f32 %v467_v47, %v428_v34  ;;  %v489_v6 = vmul.f32 0.70710677, %v481_v0  ;;  %v393_v8 = vpop.permute.xlu0 %392 }
 0x35a   :  { %v411_v10 = vsel %vm51_vm1, %v362_v3, %v393_v8 }
 0x35b   :  { %v483_v42 = vadd.f32 %v475_v5, %v411_v10  ;;  %v506_v43 = vsel %vm493_vm3, %v489_v6, 0.0 }
 0x35c   :  { %v383_v55 = vpop.permute.xlu1 %382 }
 0x35d   :  { %v406_v59 = vsel %vm51_vm1, %v357_v51, %v383_v55  ;;  %v491_v44 = vmul.f32 0.70710677, %v483_v42 }
 0x35e   :  { %v478_v61 = vadd.f32 %v470_v54, %v406_v59 }
 0x35f   :  { %v512_v46 = vsel %vm493_vm3, %v491_v44, 0.0 }
 0x360   :  { %v486_v15 = vmul.f32 0.70710677, %v478_v61  ;;  %v387_v17 = vpop.permute.xlu1 %386 }
 0x361   :  { %v408_v21 = vsel %vm51_vm1, %v359_v63, %v387_v17 }
 0x362   :  { %v480_v24 = vadd.f32 %v472_v14, %v408_v21  ;;  %v497_v26 = vsel %vm493_vm3, %v486_v15, 0.0 }
 0x363   :  { %498 = vadd.xlane.f32.xlu1 %v497_v26 }
 0x364   :  { %v391_v32 = vpop.permute.xlu1 %390  ;;  %v488_v36 = vmul.f32 0.70710677, %v480_v24 }
 0x365   :  { %v410_v37 = vsel %vm51_vm1, %v361_v28, %v391_v32 }
 0x366   :  { %v482_v11 = vadd.f32 %v474_v30, %v410_v37  ;;  %v503_v39 = vsel %vm493_vm3, %v488_v36, 0.0 }
 0x367   :  { %507 = vadd.xlane.f32.xlu1 %v506_v43  ;;  %504 = vadd.xlane.f32.xlu0 %v503_v39 }
 0x368   :  { %v395_v7 = vpop.permute.xlu1 %394  ;;  %v490_v40 = vmul.f32 0.70710677, %v482_v11 }
 0x369   :  { %v412_v9 = vsel %vm51_vm1, %v363_v2, %v395_v7 }
 0x36a   :  { %v484_v41 = vadd.f32 %v476_v4, %v412_v9  ;;  %v509_v47 = vsel %vm493_vm3, %v490_v40, 0.0 }
 0x36b   :  { %513 = vadd.xlane.f32.xlu1 %v512_v46  ;;  %510 = vadd.xlane.f32.xlu0 %v509_v47 }
 0x36c   :  { %v492_v45 = vmul.f32 0.70710677, %v484_v41 }
 0x36e   :  { %v515_v48 = vsel %vm493_vm3, %v492_v45, 0.0 }
 0x36f   :  { %516 = vadd.xlane.f32.xlu0 %v515_v48 }
 0x3e1   :  { %v496_v50 = vpop.xlane.xlu0 %495 }
 0x3e2   :  { %v519_v52 = vmul.f32 0.015625, %v496_v50 }
 0x3e4   :  { %v1065_v54 = vsub.f32 %v485_v16, %v519_v52 }
 0x3e5   :  { %v502_v55 = vpop.xlane.xlu0 %501 }
 0x3e6   :  { %v521_v56 = vmul.f32 0.015625, %v502_v55  ;;  %v535_v58 = vmul.f32 %v1065_v54, %v1065_v54 }
 0x3e8   :  { %v1071_v59 = vsub.f32 %v487_v31, %v521_v56  ;;  %v543_v61 = vsel %vm493_vm3, %v535_v58, 0.0 }
 0x3e9   :  { %544 = vadd.xlane.f32.xlu1 %v543_v61 }
 0x3ea   :  { %v537_v14 = vmul.f32 %v1071_v59, %v1071_v59 }
 0x3ec   :  { %v549_v17 = vsel %vm493_vm3, %v537_v14, 0.0 }
 0x3ed   :  { %550 = vadd.xlane.f32.xlu1 %v549_v17 }
 0x3f0   :  { %v499_v49 = vpop.xlane.xlu1 %498 }
 0x3f1   :  { %v520_v51 = vmul.f32 0.015625, %v499_v49 }
 0x3f3   :  { %v1063_v53 = vsub.f32 %v486_v15, %v520_v51 }
 0x3f4   :  { %v508_v62 = vpop.xlane.xlu1 %507  ;;  %v505_v63 = vpop.xlane.xlu0 %504 }
 0x3f5   :  { %v536_v57 = vmul.f32 %v1063_v53, %v1063_v53  ;;  %v523_v12 = vmul.f32 0.015625, %v508_v62  ;;  %v522_v13 = vmul.f32 0.015625, %v505_v63 }
 0x3f7   :  { %v546_v60 = vsel %vm493_vm3, %v536_v57, 0.0  ;;  %v1077_v15 = vsub.f32 %v489_v6, %v523_v12  ;;  %v1079_v16 = vsub.f32 %v488_v36, %v522_v13 }
 0x3f8   :  { %547 = vadd.xlane.f32.xlu0 %v546_v60  ;;  %v514_v18 = vpop.xlane.xlu1 %513  ;;  %v511_v19 = vpop.xlane.xlu0 %510 }
 0x3f9   :  { %v525_v20 = vmul.f32 0.015625, %v514_v18  ;;  %v524_v21 = vmul.f32 0.015625, %v511_v19  ;;  %v539_v22 = vmul.f32 %v1077_v15, %v1077_v15  ;;  %v538_v24 = vmul.f32 %v1079_v16, %v1079_v16 }
 0x3fb   :  { %v1086_v25 = vsub.f32 %v491_v44, %v525_v20  ;;  %v1088_v26 = vsub.f32 %v490_v40, %v524_v21  ;;  %v555_v27 = vsel %vm493_vm3, %v539_v22, 0.0  ;;  %v552_v28 = vsel %vm493_vm3, %v538_v24, 0.0 }
 0x3fc   :  { %556 = vadd.xlane.f32.xlu1 %v555_v27  ;;  %553 = vadd.xlane.f32.xlu0 %v552_v28  ;;  %v517_v29 = vpop.xlane.xlu0 %516 }
 0x3fd   :  { %v526_v30 = vmul.f32 0.015625, %v517_v29  ;;  %v541_v23 = vmul.f32 %v1086_v25, %v1086_v25  ;;  %v540_v31 = vmul.f32 %v1088_v26, %v1088_v26 }
 0x3ff   :  { %v534_v32 = vsub.f32 %v492_v45, %v526_v30  ;;  %v561_v33 = vsel %vm493_vm3, %v541_v23, 0.0  ;;  %v558_v34 = vsel %vm493_vm3, %v540_v31, 0.0 }
 0x400   :  { %562 = vadd.xlane.f32.xlu1 %v561_v33  ;;  %559 = vadd.xlane.f32.xlu0 %v558_v34 }
 0x401   :  { %v542_v35 = vmul.f32 %v534_v32, %v534_v32 }
 0x403   :  { %v564_v36 = vsel %vm493_vm3, %v542_v35, 0.0 }
 0x404   :  { %565 = vadd.xlane.f32.xlu0 %v564_v36 }
 0x476   :  { %v545_v37 = vpop.xlane.xlu1 %544 }
 0x477   :  { %v567_v11 = vmul.f32 0.015625, %v545_v37 }
 0x479   :  { %v575_v1 = vadd.f32 1e-05, %v567_v11 }
 0x47a   :  { %v551_v3 = vpop.xlane.xlu1 %550 }
 0x47b   :  { %764 = vrsqrt.f32 %v575_v1  ;;  %v569_v4 = vmul.f32 0.015625, %v551_v3 }
 0x47d   :  { %v577_v5 = vadd.f32 1e-05, %v569_v4 }
 0x485   :  { %v548_v38 = vpop.xlane.xlu0 %547  ;;  %v765_v44 = vpop.eup %764 }
 0x486   :  { %v568_v0 = vmul.f32 0.015625, %v548_v38  ;;  %v591_v48 = vmul.f32 %v765_v44, %v1065_v54 }
 0x488   :  { %v576_v2 = vadd.f32 1e-05, %v568_v0  ;;  %599 = vst.msk [vmem:[%s1143_s5] sm:$0x3] %vm493_vm3, %v591_v48 }
 0x489   :  { %v557_v6 = vpop.xlane.xlu1 %556  ;;  %v554_v7 = vpop.xlane.xlu0 %553 }
 0x48a   :  { %766 = vrsqrt.f32 %v576_v2  ;;  %v571_v8 = vmul.f32 0.015625, %v557_v6  ;;  %v570_v9 = vmul.f32 0.015625, %v554_v7 }
 0x48b   :  { %768 = vrsqrt.f32 %v577_v5 }
 0x48c   :  { %v579_v10 = vadd.f32 1e-05, %v571_v8  ;;  %v578_v39 = vadd.f32 1e-05, %v570_v9 }
 0x48d   :  { %v563_v40 = vpop.xlane.xlu1 %562  ;;  %v560_v41 = vpop.xlane.xlu0 %559 }
 0x48e   :  { %770 = vrsqrt.f32 %v579_v10  ;;  %v573_v42 = vmul.f32 0.015625, %v563_v40  ;;  %v572_v43 = vmul.f32 0.015625, %v560_v41 }
 0x48f   :  { %772 = vrsqrt.f32 %v578_v39 }
 0x490   :  { %v581_v45 = vadd.f32 1e-05, %v573_v42  ;;  %v580_v46 = vadd.f32 1e-05, %v572_v43 }
 0x491   :  { %v566_v49 = vpop.xlane.xlu0 %565 }
 0x492   :  { %774 = vrsqrt.f32 %v581_v45  ;;  %v574_v51 = vmul.f32 0.015625, %v566_v49 }
 0x493   :  { %776 = vrsqrt.f32 %v580_v46 }
 0x494   :  { %v767_v47 = vpop.eup %766  ;;  %v582_v55 = vadd.f32 1e-05, %v574_v51 }
 0x495   :  { %v592_v50 = vmul.f32 %v767_v47, %v1063_v53  ;;  %v769_v52 = vpop.eup %768 }
 0x496   :  { %v593_v54 = vmul.f32 %v769_v52, %v1071_v59  ;;  %778 = vrsqrt.f32 %v582_v55 }
 0x497   :  { %600 = vst.msk [vmem:[%s1143_s5 + $0x2] sm:$0x3] %vm493_vm3, %v592_v50 }
 0x498   :  { %601 = vst.msk [vmem:[%s1143_s5 + $0x4] sm:$0x3] %vm493_vm3, %v593_v54  ;;  %v771_v53 = vpop.eup %770 }
 0x499   :  { %v773_v56 = vpop.eup %772  ;;  %v595_v57 = vmul.f32 %v771_v53, %v1077_v15 }
 0x49a   :  { %v594_v58 = vmul.f32 %v773_v56, %v1079_v16 }
 0x49b   :  { %603 = vst.msk [vmem:[%s1143_s5 + $0x8] sm:$0x3] %vm493_vm3, %v595_v57 }
 0x49c   :  { %v775_v60 = vpop.eup %774  ;;  %602 = vst.msk [vmem:[%s1143_s5 + $0x6] sm:$0x3] %vm493_vm3, %v594_v58 }
 0x49d   :  { %v777_v59 = vpop.eup %776  ;;  %v597_v61 = vmul.f32 %v775_v60, %v1086_v25 }
 0x49e   :  { %v596_v62 = vmul.f32 %v777_v59, %v1088_v26 }
 0x49f   :  { %605 = vst.msk [vmem:[%s1143_s5 + $0xc] sm:$0x3] %vm493_vm3, %v597_v61 }
 0x4a0   :  { %v779_v63 = vpop.eup %778  ;;  %604 = vst.msk [vmem:[%s1143_s5 + $0xa] sm:$0x3] %vm493_vm3, %v596_v62 }
 0x4a1   :  { %v598_v12 = vmul.f32 %v779_v63, %v534_v32 }
 0x4a3   :  { %606 = vst.msk [vmem:[%s1143_s5 + $0xe] sm:$0x3] %vm493_vm3, %v598_v12 }

// kernel: text_encoder_forward.13
= control target key start
LH: loop header
LB: loop body
LE: loop exit
PB: predicated region body
PF: predicated region fallthrough
CT: control target
= control target key end

     0   :  { %vm31_vm0 = vcmask 523264   ;;  %vm113_vm1 = vcmask 261120   ;;  %s266_s1 = inlined_call_operand.vmem [shape: f32[64,32], index: 1, kind: input, shape index: {}]   ;;  %s267_s0 = inlined_call_operand.vmem [shape: f32[16,64], index: 0, kind: input, shape index: {}]   ;;  %s268_s2 = inlined_call_operand.vmem [shape: f32[1,32], index: 2, kind: input, shape index: {}]   ;;  %s269_s3 = inlined_call_operand.vmem [shape: f32[16,32], index: 3, kind: output, shape index: {}]  }
   0x1   :  { %v16_v0 = vld [vmem:[%s266_s1] sm:$0xff]  ;;  %v17_v1 = vld [vmem:[%s266_s1 + $0x8] sm:$0xff]  ;;  %v18_v2 = vld [vmem:[%s266_s1 + $0x10] sm:$0xff] }
   0x2   :  { %v179_v3 = vpack.c.bf16 %v17_v1, %v16_v0  ;;  %v19_v4 = vld [vmem:[%s266_s1 + $0x18] sm:$0xff]  ;;  %v20_v6 = vld [vmem:[%s266_s1 + $0x20] sm:$0xff]  ;;  %v21_v7 = vld [vmem:[%s266_s1 + $0x28] sm:$0xff] }
   0x3   :  { %v183_v5 = vpack.c.bf16 %v19_v4, %v18_v2  ;;  %v14_v8 = vld [vmem:[%s267_s0] sm:$0xff]  ;;  %v187_v9 = vpack.c.bf16 %v21_v7, %v20_v6  ;;  %v22_v10 = vld [vmem:[%s266_s1 + $0x30] sm:$0xff]  ;;  %v23_v11 = vld [vmem:[%s266_s1 + $0x38] sm:$0xff] }
   0x4   :  { %180 = vmatprep.subr.bf16.mxu0 %v179_v3  ;;  %176 = vmatprep.mubr.msk.f32.mxu0 %vm31_vm0, %v14_v8  ;;  %v191_v12 = vpack.c.bf16 %v23_v11, %v22_v10  ;;  %v15_v13 = vld [vmem:[%s267_s0 + $0x8] sm:$0xff]  ;;  %v147_v14 = vld [vmem:[%s268_s2] ss:$0 sm:$0xff] }
   0x5   :  { %182 = vmatpush3.bf16.msra.mxu0 %v179_v3 }
   0x6   :  { %184 = vmatprep.subr.bf16.mxu0 %v183_v5 }
   0x9   :  { %186 = vmatpush3.bf16.msra.mxu0 %v183_v5 }
   0xa   :  { %188 = vmatprep.subr.bf16.mxu0 %v187_v9 }
   0xd   :  { %190 = vmatpush3.bf16.msra.mxu0 %v187_v9 }
   0xe   :  { %192 = vmatprep.subr.bf16.mxu0 %v191_v12 }
  0x11   :  { %194 = vmatpush3.bf16.msra.mxu0 %v191_v12 }
  0x14   :  { %177 = vmatmul.mubr.msk.f32.vlgmr.msra.gmra.mrb[0].mxu0 %vm31_vm0, %v15_v13 }
  0xe7   :  { %v178_v15 = vpop.f32.mrb[0].mxu0 }
  0xe8   :  { %v104_v16 = vpop.f32.mrb[1].mxu0  ;;  %v110_v18 = vadd.f32 %v178_v15, %v147_v14 }
  0xe9   :  { %v105_v17 = vadd.f32 %v147_v14, %v104_v16 }
  0xea   :  { %v117_v20 = vsel %vm113_vm1, %v110_v18, 0.0 }
  0xeb   :  { %v114_v19 = vsel %vm113_vm1, %v105_v17, 0.0 }
  0xec   :  { %115 = vadd.xlane.f32.xlu0 %v114_v19 }
  0xf0   :  { %118 = vadd.xlane.f32.xlu0 %v117_v20 }
 0x179   :  { %v116_v21 = vpop.xlane.xlu0 %115 }
 0x17a   :  { %v121_v22 = vmul.f32 0.03125, %v116_v21 }
 0x17c   :  { %v123_v23 = vsub.f32 %v105_v17, %v121_v22 }
 0x17d   :  { %v119_v24 = vpop.xlane.xlu0 %118 }
 0x17e   :  { %v122_v25 = vmul.f32 0.03125, %v119_v24  ;;  %v125_v26 = vmul.f32 %v123_v23, %v123_v23 }
 0x180   :  { %v124_v27 = vsub.f32 %v110_v18, %v122_v25  ;;  %v127_v28 = vsel %vm113_vm1, %v125_v26, 0.0 }
 0x181   :  { %128 = vadd.xlane.f32.xlu1 %v127_v28 }
 0x182   :  { %v126_v29 = vmul.f32 %v124_v27, %v124_v27 }
 0x184   :  { %v130_v30 = vsel %vm113_vm1, %v126_v29, 0.0 }
 0x185   :  { %131 = vadd.xlane.f32.xlu1 %v130_v30 }
 0x20e   :  { %v129_v31 = vpop.xlane.xlu1 %128 }
 0x20f   :  { %v133_v32 = vmul.f32 0.03125, %v129_v31 }
 0x211   :  { %v135_v33 = vadd.f32 1e-05, %v133_v32 }
 0x212   :  { %v132_v34 = vpop.xlane.xlu1 %131 }
 0x213   :  { %195 = vrsqrt.f32 %v135_v33  ;;  %v134_v35 = vmul.f32 0.03125, %v132_v34 }
 0x215   :  { %v136_v36 = vadd.f32 1e-05, %v134_v35 }
 0x217   :  { %197 = vrsqrt.f32 %v136_v36 }
 0x21d   :  { %v196_v37 = vpop.eup %195 }
 0x21e   :  { %v139_v38 = vmul.f32 %v196_v37, %v123_v23 }
 0x220   :  { %141 = vst.msk [vmem:[%s269_s3] sm:$0xff] %vm113_vm1, %v139_v38 }
 0x221   :  { %v198_v39 = vpop.eup %197 }
 0x222   :  { %v140_v40 = vmul.f32 %v198_v39, %v124_v27 }
 0x224   :  { %142 = vst.msk [vmem:[%s269_s3 + $0x8] sm:$0xff] %vm113_vm1, %v140_v40 }

</bundles_post_ra>
